<compile_context>
chip_gen: v7x
topology: tpu7x:2x2x1
jax: 0.10.0
libtpu: 0.0.40
codegen_flags: <defaults>
</compile_context>

<pallas_src>
import functools

import jax
import jax.numpy as jnp
from jax.experimental import pallas as pl
from jax.experimental.pallas import tpu as pltpu


# ---------------------------------------------------------------------------
# Fused kernel: 1x1 conv (BN folded) -> SiLU -> global avg pool -> Linear.
# grid = (Cmid // TC,) reduction axis; x / logits / accumulator are resident.
# ---------------------------------------------------------------------------
def _fused_head_classifier_kernel(x_ref, w_ref, b_ref, wc_ref, bc_ref,
                                  out_ref, xb_ref, pooled_ref, acc_ref,
                                  *, n_batch, hw, inv_hw):
    # x_ref      : (N, Cin, HW) f32   resident activation slab (DMA'd once)
    # w_ref      : (TC, Cin)    bf16  BN-folded 1x1 conv weight tile
    # b_ref      : (TC, 1)      f32   BN-folded bias tile
    # wc_ref     : (Kpad, TC)   bf16  classifier weight tile (padded rows = 0)
    # bc_ref     : (Kpad, 1)    f32   classifier bias (padded rows = 0)
    # out_ref    : (Kpad, N)    f32   logits (written once, at last step)
    # xb_ref     : (N, Cin, HW) bf16  scratch: cast-once copy of x
    # pooled_ref : (TC, N)      f32   scratch: pooled features for this tile
    # acc_ref    : (Kpad, N)    f32   scratch: resident logits accumulator
    c = pl.program_id(0)

    @pl.when(c == 0)
    def _init():
        # One-time f32 -> bf16 cast of the resident slab (hoisted out of the
        # per-tile loop) and zero of the logits accumulator.
        xb_ref[...] = x_ref[...].astype(jnp.bfloat16)
        acc_ref[...] = jnp.zeros_like(acc_ref)

    w = w_ref[...]                                   # (TC, Cin) bf16
    b = b_ref[...]                                   # (TC, 1)   f32
    ones_col = jnp.ones((hw, 1), jnp.float32)        # pooling vector (MXU)

    for n in range(n_batch):                         # N is small & static
        # 1x1 conv over this Cmid tile: (TC, Cin) @ (Cin, HW) -> (TC, HW) f32.
        h = jnp.dot(w, xb_ref[n], preferred_element_type=jnp.float32)
        h = h + b                                    # folded BN bias
        h = h * jax.nn.sigmoid(h)                    # SiLU (EUP slot)
        # Global average pool over HW via MXU reduce; divisor is the true HW.
        pooled_ref[:, n:n + 1] = (
            jnp.dot(h, ones_col, preferred_element_type=jnp.float32) * inv_hw)

    # Fused classifier partial product for this Cmid tile (pooled kept in f32).
    acc_ref[...] += jnp.dot(wc_ref[...].astype(jnp.float32), pooled_ref[...],
                            preferred_element_type=jnp.float32)

    @pl.when(c == pl.num_programs(0) - 1)
    def _finalize():
        out_ref[...] = acc_ref[...] + bc_ref[...]    # bias folded into store


def _round_up(v, m):
    return (v + m - 1) // m * m


def _pick_cmid_tile(cmid, target=512):
    """Largest multiple of 128 <= target that divides Cmid (else full Cmid)."""
    if cmid % 128 != 0:
        return cmid
    t = max((min(target, cmid) // 128) * 128, 128)
    while cmid % t:
        t -= 128
    return max(t, 128)


def _vmem_limit_bytes(need_bytes):
    """VMEM budget from actual block sizes, capped by device capacity."""
    need = int(need_bytes * 1.25) + (4 << 20)        # headroom for temporaries
    cap = 64 << 20                                   # conservative (v7x per-TC)
    try:
        cap = int(pltpu.get_tpu_info().vmem_capacity_bytes)
    except Exception:
        pass
    return int(min(max(need, 16 << 20), int(cap * 0.9)))


def second_net_forward(x_nchw, params, *, cmid_tile=None):
    """x_nchw: (N, Cin, H, W) float32. Returns (N, K) float32 logits."""
    w_conv = params["w_conv"].astype(jnp.float32)     # (Cmid, Cin)
    bn_gamma = params["bn_gamma"].astype(jnp.float32)
    bn_beta = params["bn_beta"].astype(jnp.float32)
    bn_mean = params["bn_mean"].astype(jnp.float32)
    bn_var = params["bn_var"].astype(jnp.float32)
    w_fc = params["w_fc"].astype(jnp.float32)         # (K, Cmid)
    b_fc = params["b_fc"].astype(jnp.float32)         # (K,)
    eps = 1e-5

    N, Cin, H, W = x_nchw.shape
    Cmid = w_conv.shape[0]
    K = w_fc.shape[0]
    HW = H * W

    TC = cmid_tile if cmid_tile is not None else _pick_cmid_tile(Cmid)
    assert Cmid % TC == 0, "cmid_tile must divide Cmid"
    n_ct = Cmid // TC
    Kpad = _round_up(K, 128)                          # lane-aligned logits rows

    # ---- BN fold (f32) + parameter layout; no transposes of x or weights ----
    scale = bn_gamma * jax.lax.rsqrt(bn_var + eps)                 # (Cmid,)
    w_folded = (w_conv * scale[:, None]).astype(jnp.bfloat16)      # (Cmid, Cin)
    b_folded = (bn_beta - bn_mean * scale)[:, None]                # (Cmid, 1)
    wc = jnp.zeros((Kpad, Cmid), jnp.bfloat16).at[:K, :].set(
        w_fc.astype(jnp.bfloat16))                                 # (Kpad, Cmid)
    bc = jnp.zeros((Kpad, 1), jnp.float32).at[:K, 0].set(b_fc)

    # NCHW -> (N, Cin, HW) is a free reshape (no transpose, no cast pass);
    # the f32 -> bf16 cast happens once inside the kernel.
    x = x_nchw.reshape(N, Cin, HW)

    # ---- VMEM budget from the chosen blocks --------------------------------
    hw_pad = _round_up(HW, 128)
    x_bytes = N * Cin * HW * 4
    need = (2 * x_bytes                               # resident x (be generous)
            + 2 * (TC * Cin * 2 + TC * 4 + Kpad * TC * 2)   # streamed tiles x2
            + 2 * (Kpad * 4 + Kpad * N * 4)           # bc + output block
            + N * Cin * HW * 2                        # bf16 x scratch
            + TC * N * 4 + Kpad * N * 4               # pooled + accumulator
            + N * TC * hw_pad * 4                     # per-n f32 h temporaries
            + Kpad * TC * 4)                          # wc f32 upcast temp
    vmem_limit = _vmem_limit_bytes(need)

    cost = pl.CostEstimate(
        flops=int(2 * N * HW * Cin * Cmid            # head matmul
                  + 6 * N * HW * Cmid                # bias + SiLU + pooling
                  + 2 * N * Cmid * Kpad),            # classifier
        transcendentals=int(N * HW * Cmid),
        bytes_accessed=int(x_bytes + w_folded.size * 2 + b_folded.size * 4
                           + wc.size * 2 + bc.size * 4 + Kpad * N * 4),
    )

    kernel = functools.partial(_fused_head_classifier_kernel,
                               n_batch=N, hw=HW, inv_hw=1.0 / HW)

    logits_t = pl.pallas_call(
        kernel,
        out_shape=jax.ShapeDtypeStruct((Kpad, N), jnp.float32),
        grid_spec=pltpu.PrefetchScalarGridSpec(
            num_scalar_prefetch=0,
            grid=(n_ct,),
            in_specs=[
                pl.BlockSpec((N, Cin, HW), lambda c: (0, 0, 0)),   # resident x
                pl.BlockSpec((TC, Cin), lambda c: (c, 0)),         # conv W tile
                pl.BlockSpec((TC, 1), lambda c: (c, 0)),           # conv b tile
                pl.BlockSpec((Kpad, TC), lambda c: (0, c)),        # fc W tile
                pl.BlockSpec((Kpad, 1), lambda c: (0, 0)),         # fc bias
            ],
            out_specs=pl.BlockSpec((Kpad, N), lambda c: (0, 0)),
            scratch_shapes=[
                pltpu.VMEM((N, Cin, HW), jnp.bfloat16),   # cast-once x copy
                pltpu.VMEM((TC, N), jnp.float32),         # pooled tile
                pltpu.VMEM((Kpad, N), jnp.float32),       # logits accumulator
            ],
        ),
        compiler_params=pltpu.CompilerParams(
            dimension_semantics=("arbitrary",),
            vmem_limit_bytes=vmem_limit),
        cost_estimate=cost,
    )(x, w_folded, b_folded, wc, bc)

    # Tiny (Kpad, N) -> (N, K) layout fixup outside the kernel.
    return logits_t[:K, :].T


def _reference(x_nchw, params):
    """Pure-JAX f32 reference mirroring the PyTorch eval-mode forward."""
    eps = 1e-5
    w_conv = params["w_conv"]
    scale = params["bn_gamma"] / jnp.sqrt(params["bn_var"] + eps)
    y = jnp.einsum("nchw,oc->nohw", x_nchw, w_conv)
    y = y * scale[None, :, None, None] + (
        params["bn_beta"] - params["bn_mean"] * scale)[None, :, None, None]
    y = y * jax.nn.sigmoid(y)                    # SiLU
    y = jnp.mean(y, axis=(2, 3))                 # avgpool + flatten
    # Dropout is identity in eval mode.
    return y @ params["w_fc"].T + params["b_fc"]


if __name__ == "__main__":
    # Small shapes consistent with the B7 tail (scaled down): Cin=64 stands in
    # for 640, Cmid=256 for 2560, K=16 for 1000, spatial 8x8 for 19x19.
    N, Cin, Cmid, H, W, K = 2, 64, 256, 8, 8, 16

    key = jax.random.PRNGKey(0)
    k1, k2, k3, k4, k5, k6, kx = jax.random.split(key, 7)

    params = {
        "w_conv": jax.random.normal(k1, (Cmid, Cin), jnp.float32) * 0.05,
        "bn_gamma": jnp.abs(jax.random.normal(k2, (Cmid,), jnp.float32)) * 0.5 + 0.75,
        "bn_beta": jax.random.normal(k3, (Cmid,), jnp.float32) * 0.1,
        "bn_mean": jax.random.normal(k4, (Cmid,), jnp.float32) * 0.1,
        "bn_var": jnp.abs(jax.random.normal(k5, (Cmid,), jnp.float32)) * 0.5 + 0.5,
        "w_fc": jax.random.normal(k6, (K, Cmid), jnp.float32) * 0.05,
        "b_fc": jnp.linspace(-0.1, 0.1, K).astype(jnp.float32),
    }

    x = jax.random.normal(kx, (N, Cin, H, W), jnp.float32)

    # cmid_tile=128 exercises the multi-tile Cmid reduction even at toy shapes.
    out = second_net_forward(x, params, cmid_tile=128)
    out = jax.block_until_ready(out)

    ref = _reference(x, params)
    assert out.shape == (N, K)
    # bf16 MXU operands for the conv with f32 accumulation vs a pure-f32 ref.
    max_err = jnp.max(jnp.abs(out - ref))
    assert jnp.allclose(out, ref, atol=2e-2, rtol=2e-2), (
        f"mismatch: max abs err {max_err}")

    print("KERNEL_OK")
</pallas_src>

<mosaic_0001>
module attributes {stable_mosaic.version = 11 : i64} {
  func.func @_fused_head_classifier_kernel(%arg0: i32, %arg1: memref<2x64x64xf32, #tpu.memory_space<vmem>>, %arg2: memref<128x64xbf16, #tpu.memory_space<vmem>>, %arg3: memref<128x1xf32, #tpu.memory_space<vmem>>, %arg4: memref<128x128xbf16, #tpu.memory_space<vmem>>, %arg5: memref<128x1xf32, #tpu.memory_space<vmem>>, %arg6: memref<128x2xf32, #tpu.memory_space<vmem>>, %arg7: memref<2x64x64xbf16, #tpu.memory_space<vmem>>, %arg8: memref<128x2xf32, #tpu.memory_space<vmem>>, %arg9: memref<128x2xf32, #tpu.memory_space<vmem>>) attributes {dimension_semantics = [#tpu.dimension_semantics<arbitrary>], iteration_bounds = array<i64: 2>, scalar_prefetch = 0 : i64, scratch_operands = 3 : i64, tpu.core_type = #tpu.core_type<tc>, window_params = [{pipeline_mode = #tpu.pipeline_mode<synchronous>, transform_indices = @transform_0, window_bounds = array<i64: 2, 64, 64>}, {transform_indices = @transform_1, window_bounds = array<i64: 128, 64>}, {transform_indices = @transform_2, window_bounds = array<i64: 128, 1>}, {transform_indices = @transform_3, window_bounds = array<i64: 128, 128>}, {pipeline_mode = #tpu.pipeline_mode<synchronous>, transform_indices = @transform_4, window_bounds = array<i64: 128, 1>}, {pipeline_mode = #tpu.pipeline_mode<synchronous>, transform_indices = @transform_5, window_bounds = array<i64: 128, 2>}]} {
    %c0_i32 = arith.constant 0 : i32
    %0 = arith.cmpi eq, %arg0, %c0_i32 : i32
    %1 = arith.extui %0 : i1 to i32
    %c0_i32_0 = arith.constant 0 : i32
    %2 = arith.cmpi ne, %1, %c0_i32_0 : i32
    scf.if %2 {
      %c0_31 = arith.constant 0 : index
      %c0_32 = arith.constant 0 : index
      %c0_33 = arith.constant 0 : index
      %46 = vector.load %arg1[%c0_31, %c0_32, %c0_33] : memref<2x64x64xf32, #tpu.memory_space<vmem>>, vector<2x64x64xf32>
      %47 = arith.truncf %46 : vector<2x64x64xf32> to vector<2x64x64xbf16>
      %c0_34 = arith.constant 0 : index
      %c0_35 = arith.constant 0 : index
      %c0_36 = arith.constant 0 : index
      %48 = vector.load %arg7[%c0_34, %c0_35, %c0_36] : memref<2x64x64xbf16, #tpu.memory_space<vmem>>, vector<2x64x64xbf16>
      tpu.vector_store %arg7[%c0_34, %c0_35, %c0_36], %47 {strides = array<i32>} : memref<2x64x64xbf16, #tpu.memory_space<vmem>>, vector<2x64x64xbf16>,
      %cst_37 = arith.constant 0.000000e+00 : f32
      %49 = vector.broadcast %cst_37 : f32 to vector<128x2xf32>
      %c0_38 = arith.constant 0 : index
      %c0_39 = arith.constant 0 : index
      %50 = vector.load %arg9[%c0_38, %c0_39] : memref<128x2xf32, #tpu.memory_space<vmem>>, vector<128x2xf32>
      tpu.vector_store %arg9[%c0_38, %c0_39], %49 {strides = array<i32>} : memref<128x2xf32, #tpu.memory_space<vmem>>, vector<128x2xf32>,
    } else {
    }
    %c0 = arith.constant 0 : index
    %c0_1 = arith.constant 0 : index
    %3 = vector.load %arg2[%c0, %c0_1] : memref<128x64xbf16, #tpu.memory_space<vmem>>, vector<128x64xbf16>
    %c0_2 = arith.constant 0 : index
    %c0_3 = arith.constant 0 : index
    %4 = vector.load %arg3[%c0_2, %c0_3] : memref<128x1xf32, #tpu.memory_space<vmem>>, vector<128x1xf32>
    %cst = arith.constant 1.000000e+00 : f32
    %5 = vector.broadcast %cst : f32 to vector<64x1xf32>
    %c0_4 = arith.constant 0 : index
    %c0_5 = arith.constant 0 : index
    %c0_6 = arith.constant 0 : index
    %6 = vector.load %arg7[%c0_4, %c0_5, %c0_6] : memref<2x64x64xbf16, #tpu.memory_space<vmem>>, vector<1x64x64xbf16>
    %7 = vector.shape_cast %6 : vector<1x64x64xbf16> to vector<64x64xbf16>
    %cst_7 = arith.constant dense<0.000000e+00> : vector<128x64xf32>
    %8 = tpu.matmul %3, %7, %cst_7 {dimension_numbers = #tpu.dot_dimension_numbers<[1], [0], [0], [1], [0, 0, 1, 1], [], []>} : vector<128x64xbf16>, vector<64x64xbf16>, vector<128x64xf32> -> vector<128x64xf32>
    %9 = vector.broadcast %4 : vector<128x1xf32> to vector<128x64xf32>
    %10 = arith.addf %8, %9 : vector<128x64xf32>
    %11 = arith.negf %10 : vector<128x64xf32>
    %12 = math.exp %11 : vector<128x64xf32>
    %cst_8 = arith.constant 1.000000e+00 : f32
    %13 = vector.broadcast %cst_8 : f32 to vector<128x64xf32>
    %14 = arith.addf %13, %12 : vector<128x64xf32>
    %15 = arith.divf %13, %14 : vector<128x64xf32>
    %16 = arith.mulf %10, %15 : vector<128x64xf32>
    %cst_9 = arith.constant dense<0.000000e+00> : vector<128x1xf32>
    %17 = tpu.matmul %16, %5, %cst_9 {dimension_numbers = #tpu.dot_dimension_numbers<[1], [0], [0], [1], [0, 0, 1, 1], [], []>} : vector<128x64xf32>, vector<64x1xf32>, vector<128x1xf32> -> vector<128x1xf32>
    %cst_10 = arith.constant 1.562500e-02 : f32
    %18 = vector.broadcast %cst_10 : f32 to vector<128x1xf32>
    %19 = arith.mulf %17, %18 : vector<128x1xf32>
    %c0_11 = arith.constant 0 : index
    %c0_12 = arith.constant 0 : index
    %20 = vector.load %arg8[%c0_11, %c0_12] : memref<128x2xf32, #tpu.memory_space<vmem>>, vector<128x1xf32>
    tpu.vector_store %arg8[%c0_11, %c0_12], %19 {strides = array<i32>} : memref<128x2xf32, #tpu.memory_space<vmem>>, vector<128x1xf32>,
    %c1 = arith.constant 1 : index
    %c0_13 = arith.constant 0 : index
    %c0_14 = arith.constant 0 : index
    %21 = vector.load %arg7[%c1, %c0_13, %c0_14] : memref<2x64x64xbf16, #tpu.memory_space<vmem>>, vector<1x64x64xbf16>
    %22 = vector.shape_cast %21 : vector<1x64x64xbf16> to vector<64x64xbf16>
    %cst_15 = arith.constant dense<0.000000e+00> : vector<128x64xf32>
    %23 = tpu.matmul %3, %22, %cst_15 {dimension_numbers = #tpu.dot_dimension_numbers<[1], [0], [0], [1], [0, 0, 1, 1], [], []>} : vector<128x64xbf16>, vector<64x64xbf16>, vector<128x64xf32> -> vector<128x64xf32>
    %24 = vector.broadcast %4 : vector<128x1xf32> to vector<128x64xf32>
    %25 = arith.addf %23, %24 : vector<128x64xf32>
    %26 = arith.negf %25 : vector<128x64xf32>
    %27 = math.exp %26 : vector<128x64xf32>
    %cst_16 = arith.constant 1.000000e+00 : f32
    %28 = vector.broadcast %cst_16 : f32 to vector<128x64xf32>
    %29 = arith.addf %28, %27 : vector<128x64xf32>
    %30 = arith.divf %28, %29 : vector<128x64xf32>
    %31 = arith.mulf %25, %30 : vector<128x64xf32>
    %cst_17 = arith.constant dense<0.000000e+00> : vector<128x1xf32>
    %32 = tpu.matmul %31, %5, %cst_17 {dimension_numbers = #tpu.dot_dimension_numbers<[1], [0], [0], [1], [0, 0, 1, 1], [], []>} : vector<128x64xf32>, vector<64x1xf32>, vector<128x1xf32> -> vector<128x1xf32>
    %cst_18 = arith.constant 1.562500e-02 : f32
    %33 = vector.broadcast %cst_18 : f32 to vector<128x1xf32>
    %34 = arith.mulf %32, %33 : vector<128x1xf32>
    %c0_19 = arith.constant 0 : index
    %c1_20 = arith.constant 1 : index
    %35 = vector.load %arg8[%c0_19, %c1_20] : memref<128x2xf32, #tpu.memory_space<vmem>>, vector<128x1xf32>
    tpu.vector_store %arg8[%c0_19, %c1_20], %34 {strides = array<i32>} : memref<128x2xf32, #tpu.memory_space<vmem>>, vector<128x1xf32>,
    %c0_21 = arith.constant 0 : index
    %c0_22 = arith.constant 0 : index
    %36 = vector.load %arg9[%c0_21, %c0_22] : memref<128x2xf32, #tpu.memory_space<vmem>>, vector<128x2xf32>
    %c0_23 = arith.constant 0 : index
    %c0_24 = arith.constant 0 : index
    %37 = vector.load %arg4[%c0_23, %c0_24] : memref<128x128xbf16, #tpu.memory_space<vmem>>, vector<128x128xbf16>
    %38 = arith.extf %37 : vector<128x128xbf16> to vector<128x128xf32>
    %c0_25 = arith.constant 0 : index
    %c0_26 = arith.constant 0 : index
    %39 = vector.load %arg8[%c0_25, %c0_26] : memref<128x2xf32, #tpu.memory_space<vmem>>, vector<128x2xf32>
    %cst_27 = arith.constant dense<0.000000e+00> : vector<128x2xf32>
    %40 = tpu.matmul %38, %39, %cst_27 {dimension_numbers = #tpu.dot_dimension_numbers<[1], [0], [0], [1], [0, 0, 1, 1], [], []>} : vector<128x128xf32>, vector<128x2xf32>, vector<128x2xf32> -> vector<128x2xf32>
    %41 = arith.addf %36, %40 : vector<128x2xf32>
    %c0_28 = arith.constant 0 : index
    %c0_29 = arith.constant 0 : index
    %42 = vector.load %arg9[%c0_28, %c0_29] : memref<128x2xf32, #tpu.memory_space<vmem>>, vector<128x2xf32>
    tpu.vector_store %arg9[%c0_28, %c0_29], %41 {strides = array<i32>} : memref<128x2xf32, #tpu.memory_space<vmem>>, vector<128x2xf32>,
    %c1_i32 = arith.constant 1 : i32
    %43 = arith.cmpi eq, %arg0, %c1_i32 : i32
    %44 = arith.extui %43 : i1 to i32
    %c0_i32_30 = arith.constant 0 : i32
    %45 = arith.cmpi ne, %44, %c0_i32_30 : i32
    scf.if %45 {
      %c0_31 = arith.constant 0 : index
      %c0_32 = arith.constant 0 : index
      %46 = vector.load %arg9[%c0_31, %c0_32] : memref<128x2xf32, #tpu.memory_space<vmem>>, vector<128x2xf32>
      %c0_33 = arith.constant 0 : index
      %c0_34 = arith.constant 0 : index
      %47 = vector.load %arg5[%c0_33, %c0_34] : memref<128x1xf32, #tpu.memory_space<vmem>>, vector<128x1xf32>
      %48 = vector.broadcast %47 : vector<128x1xf32> to vector<128x2xf32>
      %49 = arith.addf %46, %48 : vector<128x2xf32>
      %c0_35 = arith.constant 0 : index
      %c0_36 = arith.constant 0 : index
      %50 = vector.load %arg6[%c0_35, %c0_36] : memref<128x2xf32, #tpu.memory_space<vmem>>, vector<128x2xf32>
      tpu.vector_store %arg6[%c0_35, %c0_36], %49 {strides = array<i32>} : memref<128x2xf32, #tpu.memory_space<vmem>>, vector<128x2xf32>,
    } else {
    }
    return
  }
  func.func @transform_0(%arg0: i32) -> (i32, i32, i32) {
    %c0_i32 = arith.constant 0 : i32
    %c0_i32_0 = arith.constant 0 : i32
    %c0_i32_1 = arith.constant 0 : i32
    %c0_i32_2 = arith.constant 0 : i32
    return %c0_i32, %c0_i32_0, %c0_i32_1 : i32, i32, i32
  }
  func.func @transform_1(%arg0: i32) -> (i32, i32) {
    %c0_i32 = arith.constant 0 : i32
    %c0_i32_0 = arith.constant 0 : i32
    return %arg0, %c0_i32 : i32, i32
  }
  func.func @transform_2(%arg0: i32) -> (i32, i32) {
    %c0_i32 = arith.constant 0 : i32
    %c0_i32_0 = arith.constant 0 : i32
    return %arg0, %c0_i32 : i32, i32
  }
  func.func @transform_3(%arg0: i32) -> (i32, i32) {
    %c0_i32 = arith.constant 0 : i32
    %c0_i32_0 = arith.constant 0 : i32
    return %c0_i32, %arg0 : i32, i32
  }
  func.func @transform_4(%arg0: i32) -> (i32, i32) {
    %c0_i32 = arith.constant 0 : i32
    %c0_i32_0 = arith.constant 0 : i32
    %c0_i32_1 = arith.constant 0 : i32
    return %c0_i32, %c0_i32_0 : i32, i32
  }
  func.func @transform_5(%arg0: i32) -> (i32, i32) {
    %c0_i32 = arith.constant 0 : i32
    %c0_i32_0 = arith.constant 0 : i32
    %c0_i32_1 = arith.constant 0 : i32
    return %c0_i32, %c0_i32_0 : i32, i32
  }
}

</mosaic_0001>

<bundles_post_ra>
// kernel: tpu_custom_call.1
= control target key start
LH: loop header
LB: loop body
LE: loop exit
PB: predicated region body
PF: predicated region fallthrough
CT: control target
= control target key end

     0   :  { %s2692_s18 = smov 0   ;;  %s2694_s19 = smov 0   ;;  %s3378_s0 = inlined_call_operand.vmem [shape: f32[2,64,64], index: 0, kind: input, shape index: {}]   ;;  %s3379_s1 = inlined_call_operand.vmem [shape: bf16[256,64], index: 1, kind: input, shape index: {}]   ;;  %s3380_s2 = inlined_call_operand.vmem [shape: f32[256,1], index: 2, kind: input, shape index: {}]   ;;  %s3381_s3 = inlined_call_operand.vmem [shape: bf16[128,256], index: 3, kind: input, shape index: {}]   ;;  %s3382_s4 = inlined_call_operand.vmem [shape: f32[128,1], index: 4, kind: input, shape index: {}]   ;;  %s3383_s5 = inlined_call_operand.vmem [shape: f32[128,2], index: 5, kind: output, shape index: {}]  }
   0x1   :  { %s2696_s20 = smov 0  }
   0x2 LB: > { %s2708_s21 = sadd.s32 4294967295, %s2655_s20   ;;  %s2711_s22 = sadd.s32 1, %s2655_s20   ;;  %s2655_s20 = sphi %s2696_s20, %s3386_s20   ;;  %s2651_s19 = sphi %s2694_s19, %s3385_s19   ;;  %s2647_s18 = sphi %s2692_s18, %s3384_s18  }
   0x3   : > { %s92_s23 = ssub.s32 %s2655_s20, %s2711_s22  ;;  %s95_s24 = sadd.s32 1, %s2651_s19 }
   0x4   : > { %p93_p0 = scmp.eq.s32.totalorder %s92_s23, 0  ;;  %p102_p1 = scmp.ne.s32.totalorder %s2651_s19, %s2647_s18 }
   0x5   : > { %p103_p2 = scmp.eq.s32.totalorder %s2655_s20, 0  ;;  %p1980_p4 = scmp.ge.s32.totalorder %s2655_s20, 2 }
   0x6   : > { %s2720_s25 = scalar_select %p93_p0, %s2651_s19, %s95_s24  }
   0x7   : > { %p104_p3 = por %p103_p2, %p102_p1  ;;  %176 = sbr.rel (%p1980_p4) target bundleno = 28 (0x1c), region = 24 }
   0xe   : > { %197 = sbr.rel (!%p104_p3) target bundleno = 28 (0x1c), region = 36  ;;  %s199_s26 = sand.u32 (%p104_p3), 1, %s2651_s19  }
   0xf   : > { %s1982_s27 = sshll.u32 (%p104_p3), %s2655_s20, 2  ;;  %s1981_s28 = sshll.u32 (%p104_p3), %s199_s26, 6 }
  0x10   : > { %s2728_s6 = scalar_lea.vmem (%p104_p3), %s3381_s3, %s1982_s27  ;;  %s201_s7 = scalar_lea.vmem (%p104_p3), [#allocation5], %s1981_s28 }
  0x11   : > { %v219_v0 = vld [vmem:[%s2728_s6] sm:$0xf] (%p104_p3)  ;;  %v221_v1 = vld [vmem:[%s2728_s6 + $0x8] sm:$0xf] (%p104_p3)  ;;  %v223_v2 = vld [vmem:[%s2728_s6 + $0x10] sm:$0xf] (%p104_p3) }
  0x12   : > { %220 = vst [vmem:[%s201_s7] sm:$0xf] (%p104_p3), %v219_v0  ;;  %222 = vst [vmem:[%s201_s7 + $0x4] sm:$0xf] (%p104_p3), %v221_v1  ;;  %v225_v3 = vld [vmem:[%s2728_s6 + $0x18] sm:$0xf] (%p104_p3) }
  0x13   : > { %v227_v4 = vld [vmem:[%s2728_s6 + $0x20] sm:$0xf] (%p104_p3)  ;;  %224 = vst [vmem:[%s201_s7 + $0x8] sm:$0xf] (%p104_p3), %v223_v2  ;;  %226 = vst [vmem:[%s201_s7 + $0xc] sm:$0xf] (%p104_p3), %v225_v3 }
  0x14   : > { %228 = vst [vmem:[%s201_s7 + $0x10] sm:$0xf] (%p104_p3), %v227_v4  ;;  %v229_v5 = vld [vmem:[%s2728_s6 + $0x28] sm:$0xf] (%p104_p3)  ;;  %v231_v6 = vld [vmem:[%s2728_s6 + $0x30] sm:$0xf] (%p104_p3) }
  0x15   : > { %v233_v7 = vld [vmem:[%s2728_s6 + $0x38] sm:$0xf]  ;;  %230 = vst [vmem:[%s201_s7 + $0x14] sm:$0xf] %v229_v5  ;;  %232 = vst [vmem:[%s201_s7 + $0x18] sm:$0xf] %v231_v6 }
  0x16   : > { %234 = vst [vmem:[%s201_s7 + $0x1c] sm:$0xf] %v233_v7  ;;  %v235_v8 = vld [vmem:[%s2728_s6 + $0x40] sm:$0xf]  ;;  %v237_v9 = vld [vmem:[%s2728_s6 + $0x48] sm:$0xf] }
  0x17   : > { %v239_v10 = vld [vmem:[%s2728_s6 + $0x50] sm:$0xf]  ;;  %236 = vst [vmem:[%s201_s7 + $0x20] sm:$0xf] %v235_v8  ;;  %238 = vst [vmem:[%s201_s7 + $0x24] sm:$0xf] %v237_v9 }
  0x18   : > { %240 = vst [vmem:[%s201_s7 + $0x28] sm:$0xf] %v239_v10  ;;  %v241_v11 = vld [vmem:[%s2728_s6 + $0x58] sm:$0xf]  ;;  %v243_v12 = vld [vmem:[%s2728_s6 + $0x60] sm:$0xf] }
  0x19   : > { %v245_v13 = vld [vmem:[%s2728_s6 + $0x68] sm:$0xf]  ;;  %242 = vst [vmem:[%s201_s7 + $0x2c] sm:$0xf] %v241_v11  ;;  %244 = vst [vmem:[%s201_s7 + $0x30] sm:$0xf] %v243_v12 }
  0x1a   : > { %246 = vst [vmem:[%s201_s7 + $0x34] sm:$0xf] %v245_v13  ;;  %v247_v14 = vld [vmem:[%s2728_s6 + $0x70] sm:$0xf]  ;;  %v249_v15 = vld [vmem:[%s2728_s6 + $0x78] sm:$0xf] }
  0x1b   : > { %248 = vst [vmem:[%s201_s7 + $0x38] sm:$0xf] %v247_v14  ;;  %250 = vst [vmem:[%s201_s7 + $0x3c] sm:$0xf] %v249_v15 }
  0x1c PF: > { %p1983_p5 = scmp.ge.s32.totalorder %s2655_s20, 1  ;;  %p304_p6 = scmp.lt.s32.totalorder %s2655_s20, 3 }
  0x1e   : > { %p305_p7 = pnand %p1983_p5, %p304_p6 }
  0x1f   : > { %s311_s8 = sand.u32 (!%p305_p7), 1, %s2647_s18   ;;  %s1985_s9 = sshll.u32 (!%p305_p7), %s2708_s21, 4 }
  0x20   : > { %308 = sbr.rel (%p305_p7) target bundleno = 1081 (0x439), region = 77  ;;  %s1984_s10 = sshll.u32 (!%p305_p7), %s311_s8, 6 }
  0x21   : > { %p344_p8 = scmp.lt.s32.totalorder (!%p305_p7), %s1985_s9, 31  ;;  %s2760_s23 = scalar_lea.vmem (!%p305_p7), [#allocation5], %s1984_s10 }
  0x22   : > { %p1989_p9 = scmp.ne.s32.totalorder (!%p305_p7), %s2708_s21, 0 }
  0x27   : > { %s3388_s9 = smov (!%p344_p8, %s1985_s9), 31  ;;  %359 = sbr.rel (%p1989_p9) target bundleno = 54 (0x36), region = 85 }
  0x28   : > { %s1986_s11 = sshll.u32 %s3388_s9, 2  ;;  %s1988_s12 = sshll.u32 %s3388_s9, 3  ;;  %v360_v16 = vld [vmem:[%s3378_s0] sm:$0xff] (!%p1989_p9)  ;;  %v361_v17 = vld [vmem:[%s3378_s0 + $0x8] sm:$0xff] (!%p1989_p9)  ;;  %vm384_vm0 = vcmask (!%p1989_p9), 523264   ;;  %v362_v18 = vld [vmem:[%s3378_s0 + $0x10] sm:$0xff] (!%p1989_p9) }
  0x29   : > { %s2753_s15 = scalar_lea.vmem %s3379_s1, %s1986_s11  ;;  %s2758_s20 = scalar_lea.vmem %s3380_s2, %s1988_s12  ;;  %vm393_vm1 = vcmask (!%p1989_p9), 15360   ;;  %v376_v19 = vpack.c.bf16 (!%p1989_p9), %v361_v17, %v360_v16  ;;  %v363_v20 = vld [vmem:[%s3378_s0 + $0x18] sm:$0xff] (!%p1989_p9)  ;;  %v364_v21 = vld [vmem:[%s3378_s0 + $0x20] sm:$0xff] (!%p1989_p9)  ;;  %v365_v22 = vld [vmem:[%s3378_s0 + $0x28] sm:$0xff] (!%p1989_p9)  ;;  %v2657_v23 = vmov (!%p1989_p9), 0.0  }
  0x2a   : > { %394 = vst.msk [vmem:[#allocation4] sm:$0xff] (!%p1989_p9), %vm393_vm1, %v2657_v23  ;;  %395 = vst.msk [vmem:[#allocation4 + $0x8] sm:$0xff] (!%p1989_p9), %vm393_vm1, %v2657_v23  ;;  %v377_v24 = vpack.c.bf16 (!%p1989_p9), %v363_v20, %v362_v18  ;;  %v378_v25 = vpack.c.bf16 (!%p1989_p9), %v365_v22, %v364_v21  ;;  %v366_v26 = vld [vmem:[%s3378_s0 + $0x30] sm:$0xff] (!%p1989_p9)  ;;  %v367_v27 = vld [vmem:[%s3378_s0 + $0x38] sm:$0xff] (!%p1989_p9) }
  0x2b   : > { %396 = vst.msk [vmem:[#allocation4 + $0x10] sm:$0xff] (!%p1989_p9), %vm393_vm1, %v2657_v23  ;;  %397 = vst.msk [vmem:[#allocation4 + $0x18] sm:$0xff] (!%p1989_p9), %vm393_vm1, %v2657_v23  ;;  %v368_v28 = vld [vmem:[%s3378_s0 + $0x40] sm:$0xff] (!%p1989_p9)  ;;  %v379_v29 = vpack.c.bf16 (!%p1989_p9), %v367_v27, %v366_v26  ;;  %v369_v30 = vld [vmem:[%s3378_s0 + $0x48] sm:$0xff] (!%p1989_p9) }
  0x2c   : > { %398 = vst.msk [vmem:[#allocation4 + $0x20] sm:$0xff] (!%p1989_p9), %vm393_vm1, %v2657_v23  ;;  %399 = vst.msk [vmem:[#allocation4 + $0x28] sm:$0xff] (!%p1989_p9), %vm393_vm1, %v2657_v23  ;;  %v370_v31 = vld [vmem:[%s3378_s0 + $0x50] sm:$0xff] (!%p1989_p9)  ;;  %v371_v32 = vld [vmem:[%s3378_s0 + $0x58] sm:$0xff] (!%p1989_p9)  ;;  %v380_v33 = vpack.c.bf16 (!%p1989_p9), %v369_v30, %v368_v28 }
  0x2d   : > { %400 = vst.msk [vmem:[#allocation4 + $0x30] sm:$0xff] (!%p1989_p9), %vm393_vm1, %v2657_v23  ;;  %401 = vst.msk [vmem:[#allocation4 + $0x38] sm:$0xff] (!%p1989_p9), %vm393_vm1, %v2657_v23  ;;  %v381_v34 = vpack.c.bf16 (!%p1989_p9), %v371_v32, %v370_v31  ;;  %v372_v35 = vld [vmem:[%s3378_s0 + $0x60] sm:$0xff] (!%p1989_p9)  ;;  %v373_v36 = vld [vmem:[%s3378_s0 + $0x68] sm:$0xff] (!%p1989_p9) }
  0x2e   : > { %402 = vst.msk [vmem:[#allocation4 + $0x40] sm:$0xff] %vm393_vm1, %v2657_v23  ;;  %403 = vst.msk [vmem:[#allocation4 + $0x48] sm:$0xff] %vm393_vm1, %v2657_v23  ;;  %v374_v37 = vld [vmem:[%s3378_s0 + $0x70] sm:$0xff]  ;;  %v382_v38 = vpack.c.bf16 %v373_v36, %v372_v35  ;;  %v375_v39 = vld [vmem:[%s3378_s0 + $0x78] sm:$0xff] }
  0x2f   : > { %404 = vst.msk [vmem:[#allocation4 + $0x50] sm:$0xff] %vm393_vm1, %v2657_v23  ;;  %405 = vst.msk [vmem:[#allocation4 + $0x58] sm:$0xff] %vm393_vm1, %v2657_v23  ;;  %v383_v40 = vpack.c.bf16 %v375_v39, %v374_v37 }
  0x30   : > { %406 = vst.msk [vmem:[#allocation4 + $0x60] sm:$0xff] %vm393_vm1, %v2657_v23  ;;  %407 = vst.msk [vmem:[#allocation4 + $0x68] sm:$0xff] %vm393_vm1, %v2657_v23 }
  0x31   : > { %408 = vst.msk [vmem:[#allocation4 + $0x70] sm:$0xff] %vm393_vm1, %v2657_v23  ;;  %409 = vst.msk [vmem:[#allocation4 + $0x78] sm:$0xff] %vm393_vm1, %v2657_v23 }
  0x32   : > { %385 = vst.msk [vmem:[#allocation2] sm:$0xff] %vm384_vm0, %v376_v19  ;;  %386 = vst.msk [vmem:[#allocation2 + $0x8] sm:$0xff] %vm384_vm0, %v377_v24 }
  0x33   : > { %387 = vst.msk [vmem:[#allocation2 + $0x10] sm:$0xff] %vm384_vm0, %v378_v25  ;;  %388 = vst.msk [vmem:[#allocation2 + $0x18] sm:$0xff] %vm384_vm0, %v379_v29 }
  0x34   : > { %389 = vst.msk [vmem:[#allocation2 + $0x20] sm:$0xff] %vm384_vm0, %v380_v33  ;;  %390 = vst.msk [vmem:[#allocation2 + $0x28] sm:$0xff] %vm384_vm0, %v381_v34 }
  0x35   : > { %391 = vst.msk [vmem:[#allocation2 + $0x30] sm:$0xff] %vm384_vm0, %v382_v38  ;;  %392 = vst.msk [vmem:[#allocation2 + $0x38] sm:$0xff] %vm384_vm0, %v383_v40 }
  0x36 PF: > { %vm566_vm2 = vcmask 523264   ;;  %v2495_v43 = vld [vmem:[%s2753_s15] sm:$0xff]   ;;  %v2658_v46 = vmov 0   ;;  %v428_v49 = vld [vmem:[%s2758_s20 + $0x10] sm:$0xff]  ;;  %v2497_v50 = vld [vmem:[%s2753_s15 + $0x8] sm:$0xff]   ;;  %vm1009_vm3 = vcmask 7168  }
  0x37   : > { %v2837_v44 = vld [vmem:[%s2753_s15 + $0x20] sm:$0xff]   ;;  %2232 = vmatprep.mubr.msk.bf16.mxu0 %vm566_vm2, %v2495_v43  ;;  %2493 = vset.pattern.permute.xlu0 %v2658_v46  ;;  %v2498_v52 = vld [vmem:[%s2753_s15 + $0x28] sm:$0xff]   ;;  %v429_v54 = vld [vmem:[%s2758_s20 + $0x18] sm:$0xff]  ;;  %v2659_v10 = vmov 1.0|1.0   ;;  %vm1513_vm4 = vcmask 15368  }
  0x38   : > { %2240 = vmatprep.mubr.msk.bf16.mxu1 %vm566_vm2, %v2837_v44  ;;  %2494 = vset.pattern.permute.xlu1 %v2658_v46  ;;  %v426_v48 = vld [vmem:[%s2758_s20] sm:$0xff]  ;;  %v427_v53 = vld [vmem:[%s2758_s20 + $0x8] sm:$0xff]  ;;  %v2499_v55 = vld [vmem:[%s2753_s15 + $0x10] sm:$0xff]   ;;  %vm1755_vm5 = vcmask 15360   ;;  %p2078_p10 = scmp.ne.s32.totalorder %s2708_s21, 1 }
  0x39   : > { %v442_v41 = vld [vmem:[#allocation2] sm:$0xff]  ;;  %v443_v42 = vld [vmem:[#allocation2 + $0x8] sm:$0xff]  ;;  %448 = vperm.xlu0 %2493, %v426_v48   ;;  %458 = vperm.xlu1 %2494, %v428_v49   ;;  %v2500_v56 = vld [vmem:[%s2753_s15 + $0x30] sm:$0xff]  }
  0x3a   : > { %2224 = vmatprep.subr.bf16.mxu0 %v442_v41  ;;  %2456 = vmatprep.subr.bf16.mxu1 %v442_v41  ;;  %v444_v45 = vld [vmem:[#allocation2 + $0x10] sm:$0xff]  ;;  %v445_v47 = vld [vmem:[#allocation2 + $0x18] sm:$0xff]  ;;  %v430_v58 = vld [vmem:[%s2758_s20 + $0x20] sm:$0xff] }
  0x3b   : > { %2225 = vmatpush3.bf16.msra.mxu0 %v442_v41  ;;  %2460 = vmatpush3.bf16.msra.mxu1 %v442_v41  ;;  %v1027_v51 = vld [vmem:[#allocation2 + $0x20] sm:$0xff]  ;;  %v1028_v57 = vld [vmem:[#allocation2 + $0x28] sm:$0xff]  ;;  %v2501_v60 = vld [vmem:[%s2753_s15 + $0x18] sm:$0xff]  }
  0x3c   : > { %2226 = vmatprep.subr.bf16.mxu0 %v443_v42  ;;  %2457 = vmatprep.subr.bf16.mxu1 %v443_v42  ;;  %v431_v59 = vld [vmem:[%s2758_s20 + $0x28] sm:$0xff]  ;;  %v1029_v61 = vld [vmem:[#allocation2 + $0x30] sm:$0xff]  ;;  %v2502_v62 = vld [vmem:[%s2753_s15 + $0x38] sm:$0xff]   ;;  %s2660_s15 = smov 1  }
  0x3d   : > { %453 = vperm.xlu0 %2493, %v427_v53   ;;  %463 = vperm.xlu1 %2494, %v429_v54   ;;  %v432_v63 = vld [vmem:[%s2758_s20 + $0x30] sm:$0xff]  ;;  %v433_v0 = vld [vmem:[%s2758_s20 + $0x38] sm:$0xff]  ;;  %v434_v2 = vld [vmem:[%s2758_s20 + $0x40] sm:$0xff] }
  0x3e   : > { %v1030_v1 = vld [vmem:[#allocation2 + $0x38] sm:$0xff]  ;;  %v435_v3 = vld [vmem:[%s2758_s20 + $0x48] sm:$0xff]  ;;  %v436_v4 = vld [vmem:[%s2758_s20 + $0x50] sm:$0xff] }
  0x3f   : > { %2227 = vmatpush3.bf16.msra.mxu0 %v443_v42  ;;  %2461 = vmatpush3.bf16.msra.mxu1 %v443_v42  ;;  %v437_v5 = vld [vmem:[%s2758_s20 + $0x58] sm:$0xff]  ;;  %v438_v6 = vld [vmem:[%s2758_s20 + $0x60] sm:$0xff]  ;;  %v439_v7 = vld [vmem:[%s2758_s20 + $0x68] sm:$0xff] }
  0x40   : > { %2228 = vmatprep.subr.bf16.mxu0 %v444_v45  ;;  %2458 = vmatprep.subr.bf16.mxu1 %v444_v45  ;;  %v440_v8 = vld [vmem:[%s2758_s20 + $0x70] sm:$0xff]  ;;  %v441_v9 = vld [vmem:[%s2758_s20 + $0x78] sm:$0xff] }
  0x41   : > { %468 = vperm.xlu0 %2493, %v430_v58   ;;  %473 = vperm.xlu1 %2494, %v431_v59  }
  0x43   : > { %2229 = vmatpush3.bf16.msra.mxu0 %v444_v45  ;;  %2462 = vmatpush3.bf16.msra.mxu1 %v444_v45 }
  0x44   : > { %2230 = vmatprep.subr.bf16.mxu0 %v445_v47  ;;  %2459 = vmatprep.subr.bf16.mxu1 %v445_v47 }
  0x45   : > { %478 = vperm.xlu0 %2493, %v432_v63   ;;  %483 = vperm.xlu1 %2494, %v433_v0  }
  0x47   : > { %2231 = vmatpush3.bf16.msra.mxu0 %v445_v47  ;;  %2463 = vmatpush3.bf16.msra.mxu1 %v445_v47 }
  0x48   : > { %2288 = vmatprep.subr.bf16.mxu0 %v1027_v51  ;;  %2408 = vmatprep.subr.bf16.mxu1 %v2659_v10 }
  0x49   : > { %488 = vperm.xlu0 %2493, %v434_v2   ;;  %493 = vperm.xlu1 %2494, %v435_v3  }
  0x4a   : > { %2233 = vmatmul.mubr.msk.bf16.vlgmr.msra.gmra.mrb[0].mxu0 %vm566_vm2, %v2497_v50  ;;  %2241 = vmatmul.mubr.msk.bf16.vlgmr.msra.gmra.mrb[0].mxu1 %vm566_vm2, %v2498_v52 }
  0x4b   : > { %2289 = vmatpush3.bf16.msra.mxu0 %v1027_v51  ;;  %2236 = vmatprep.mubr.msk.bf16.mxu0 %vm566_vm2, %v2499_v55 }
  0x4c   : > { %2290 = vmatprep.subr.bf16.mxu0 %v1028_v57  ;;  %2244 = vmatprep.mubr.msk.bf16.mxu1 %vm566_vm2, %v2500_v56 }
  0x4d   : > { %498 = vperm.xlu0 %2493, %v436_v4   ;;  %503 = vperm.xlu1 %2494, %v437_v5  }
  0x4e   : > { %2409 = vmatpush3.bf16.msra.mxu1 %v2659_v10 }
  0x4f   : > { %2291 = vmatpush3.bf16.msra.mxu0 %v1028_v57  ;;  %2410 = vmatprep.subr.bf16.mxu1 %v2659_v10 }
  0x50   : > { %2292 = vmatprep.subr.bf16.mxu0 %v1029_v61 }
  0x51   : > { %508 = vperm.xlu0 %2493, %v438_v6   ;;  %513 = vperm.xlu1 %2494, %v439_v7  }
  0x52   : > { %2237 = vmatmul.mubr.msk.bf16.gmra.mrb[4].mxu0 %vm566_vm2, %v2501_v60  ;;  %2245 = vmatmul.mubr.msk.bf16.gmra.mrb[4].mxu1 %vm566_vm2, %v2502_v62 }
  0x53   : > { %2293 = vmatpush3.bf16.msra.mxu0 %v1029_v61  ;;  %2296 = vmatprep.mubr.msk.bf16.mxu0 %vm566_vm2, %v2495_v43 }
  0x54   : > { %2294 = vmatprep.subr.bf16.mxu0 %v1030_v1  ;;  %2411 = vmatpush3.bf16.msra.mxu1 %v2659_v10 }
  0x55   : > { %518 = vperm.xlu0 %2493, %v440_v8   ;;  %523 = vperm.xlu1 %2494, %v441_v9  }
  0x56   : > { %2412 = vmatprep.subr.bf16.mxu1 %v2659_v10 }
  0x57   : > { %2295 = vmatpush3.bf16.msra.mxu0 %v1030_v1 }
  0x58   : > { %2413 = vmatpush3.bf16.msra.mxu1 %v2659_v10 }
  0x59   : > { %2414 = vmatprep.subr.bf16.mxu1 %v2659_v10 }
  0x5a   : > { %2297 = vmatmul.mubr.msk.bf16.vlgmr.msra.gmra.mrb[8].mxu0 %vm566_vm2, %v2497_v50 }
  0x5b   : > { %2300 = vmatprep.mubr.msk.bf16.mxu0 %vm566_vm2, %v2499_v55 }
  0x5c   : > { %2415 = vmatpush3.bf16.msra.mxu1 %v2659_v10 }
  0x5d   : > { %2416 = vmatprep.subr.bf16.mxu1 %v2659_v10 }
  0x62   : > { %2301 = vmatmul.mubr.msk.bf16.gmra.mrb[12].mxu0 %vm566_vm2, %v2501_v60 }
  0x63   : > { %2304 = vmatprep.mubr.msk.bf16.mxu0 %vm566_vm2, %v2837_v44 }
  0x6a   : > { %2305 = vmatmul.mubr.msk.bf16.gmra.mrb[16].mxu0 %vm566_vm2, %v2498_v52 }
  0x6b   : > { %2308 = vmatprep.mubr.msk.bf16.mxu0 %vm566_vm2, %v2500_v56 }
  0x72   : > { %2309 = vmatmul.mubr.msk.bf16.gmra.mrb[20].mxu0 %vm566_vm2, %v2502_v62 }
  0xb8   : > { %v2888_v11 = vpop.permute.xlu0 %448  ;;  %v2892_v13 = vpop.permute.xlu1 %458 }
  0xbc   : > { %v2890_v12 = vpop.permute.xlu0 %453  ;;  %v2896_v15 = vpop.permute.xlu1 %463 }
  0xc0   : > { %v2894_v14 = vpop.permute.xlu0 %468  ;;  %v2917_v32 = vpop.permute.xlu1 %473 }
  0xc4   : > { %v2898_v16 = vpop.permute.xlu0 %478  ;;  %v2931_v44 = vpop.permute.xlu1 %483 }
  0xc8   : > { %v2919_v33 = vpop.permute.xlu0 %488  ;;  %v2946_v53 = vpop.permute.xlu1 %493 }
  0xcc   : > { %v2934_v46 = vpop.permute.xlu0 %498  ;;  %v2964_v4 = vpop.permute.xlu1 %503 }
  0xd0   : > { %v2971_v8 = vpop.permute.xlu0 %508 }
 0x11d   : > { %v2234_v17 = vpop.f32.mrb[0].mxu0  ;;  %v2242_v18 = vpop.f32.mrb[0].mxu1 }
 0x11e   : > { %v2901_v19 = vadd.f32 %v2234_v17, %v2892_v13  ;;  %v625_v20 = vpop.f32.mrb[1].mxu0  ;;  %v657_v21 = vpop.f32.mrb[1].mxu1  ;;  %v2937_v47 = vadd.f32 %v2242_v18, %v2934_v46 }
 0x11f   : > { %v2904_v22 = vadd.f32 %v625_v20, %v2888_v11  ;;  %v2235_v23 = vpop.f32.mrb[2].mxu0  ;;  %v2906_v24 = vpop.f32.mrb[2].mxu1  ;;  %v2958_v63 = vadd.f32 %v657_v21, %v2919_v33 }
 0x120   : > { %v2008_v25 = vmul.f32 -1.442695, %v2901_v19  ;;  %v2910_v26 = vadd.f32 %v2235_v23, %v2896_v15  ;;  %v628_v27 = vpop.f32.mrb[3].mxu0  ;;  %v660_v28 = vpop.f32.mrb[3].mxu1  ;;  %v2016_v54 = vmul.f32 -1.442695, %v2937_v47 }
 0x121   : > { %v2006_v29 = vmul.f32 -1.442695, %v2904_v22  ;;  %v2914_v30 = vadd.f32 %v628_v27, %v2890_v12  ;;  %v2961_v2 = vadd.f32 %v660_v28, %v2946_v53  ;;  %v2014_v17 = vmul.f32 -1.442695, %v2958_v63 }
 0x122   : > { %v2009_v31 = vmul.f32 -1.442695, %v2910_v26  ;;  %2503 = vpow2.f32 %v2008_v25  ;;  %v2983_v25 = vadd.f32 %v2906_v24, %v2964_v4 }
 0x123   : > { %2505 = vpow2.f32 %v2006_v29  ;;  %v2007_v34 = vmul.f32 -1.442695, %v2914_v30  ;;  %v2015_v21 = vmul.f32 -1.442695, %v2961_v2 }
 0x124   : > { %2507 = vpow2.f32 %v2009_v31  ;;  %v2989_v31 = vpop.permute.xlu1 %513 }
 0x125   : > { %v2238_v35 = vpop.f32.mrb[4].mxu0  ;;  %v2922_v36 = vpop.f32.mrb[4].mxu1  ;;  %2509 = vpow2.f32 %v2007_v34 }
 0x126   : > { %v641_v37 = vpop.f32.mrb[5].mxu0  ;;  %v673_v38 = vpop.f32.mrb[5].mxu1  ;;  %v2942_v51 = vadd.f32 %v2238_v35, %v2898_v16 }
 0x127   : > { %v2925_v39 = vadd.f32 %v641_v37, %v2894_v14  ;;  %v2239_v40 = vpop.f32.mrb[6].mxu0  ;;  %v2927_v41 = vpop.f32.mrb[6].mxu1  ;;  %v2987_v28 = vadd.f32 %v673_v38, %v2971_v8 }
 0x128   : > { %v644_v42 = vpop.f32.mrb[7].mxu0  ;;  %v2929_v43 = vpop.f32.mrb[7].mxu1  ;;  %v2952_v59 = vadd.f32 %v2239_v40, %v2931_v44  ;;  %v2012_v62 = vmul.f32 -1.442695, %v2942_v51  ;;  %v2017_v40 = vmul.f32 -1.442695, %v2983_v25 }
 0x129   : > { %v2010_v45 = vmul.f32 -1.442695, %v2925_v39  ;;  %v2967_v5 = vadd.f32 %v644_v42, %v2917_v32  ;;  %v2991_v34 = vpop.permute.xlu0 %518 }
 0x12a   : > { %v2013_v3 = vmul.f32 -1.442695, %v2952_v59  ;;  %v2997_v24 = vadd.f32 %v2922_v36, %v2991_v34 }
 0x12b   : > { %2511 = vpow2.f32 %v2010_v45  ;;  %v2011_v27 = vmul.f32 -1.442695, %v2967_v5  ;;  %v2018_v45 = vmul.f32 -1.442695, %v2987_v28 }
 0x12c   : > { %v2504_v48 = vpop.eup %2503 }
 0x12d   : > { %v2939_v49 = vpop.f32.mrb[8].mxu0  ;;  %v2506_v50 = vpop.eup %2505  ;;  %v738_v58 = vadd.f32 1.0, %v2504_v48 }
 0x12e   : > { %v2944_v52 = vpop.f32.mrb[9].mxu0  ;;  %v736_v55 = vadd.f32 1.0, %v2506_v50  ;;  %v2508_v57 = vpop.eup %2507 }
 0x12f   : > { %v2949_v56 = vpop.f32.mrb[10].mxu0  ;;  %v2510_v61 = vpop.eup %2509  ;;  %v739_v0 = vadd.f32 1.0, %v2508_v57 }
 0x130   : > { %v2954_v60 = vpop.f32.mrb[11].mxu0  ;;  %2513 = vrcp.f32 %v736_v55  ;;  %v737_v1 = vadd.f32 1.0, %v2510_v61 }
 0x131   : > { %2515 = vpow2.f32 %v2016_v54 }
 0x132   : > { %2517 = vrcp.f32 %v738_v58 }
 0x133   : > { %2519 = vrcp.f32 %v737_v1 }
 0x134   : > { %2521 = vpow2.f32 %v2012_v62  ;;  %v2020_v62 = vmul.f32 -1.442695, %v2997_v24 }
 0x135   : > { %v2969_v6 = vpop.f32.mrb[12].mxu0  ;;  %v2512_v7 = vpop.eup %2511  ;;  %2523 = vrcp.f32 %v739_v0 }
 0x136   : > { %v2973_v9 = vpop.f32.mrb[13].mxu0  ;;  %v740_v18 = vadd.f32 1.0, %v2512_v7  ;;  %2525 = vpow2.f32 %v2013_v3  ;;  %v3016_v3 = vpop.permute.xlu1 %523 }
 0x137   : > { %v2976_v20 = vpop.f32.mrb[14].mxu0  ;;  %v3021_v7 = vadd.f32 %v2927_v41, %v3016_v3 }
 0x138   : > { %v2979_v23 = vpop.f32.mrb[15].mxu0  ;;  %2527 = vrcp.f32 %v740_v18 }
 0x139   : > { %2529 = vpow2.f32 %v2014_v17 }
 0x13a   : > { %v2514_v29 = vpop.eup %2513  ;;  %2531 = vpow2.f32 %v2015_v21  ;;  %v3030_v21 = vadd.f32 %v2944_v52, %v2888_v11  ;;  %v3041_v11 = vadd.f32 %v2954_v60, %v2890_v12  ;;  %v3057_v60 = vadd.f32 %v2949_v56, %v2896_v15 }
 0x13b   : > { %v784_v35 = vmul.f32 %v2514_v29, %v2904_v22  ;;  %v2516_v37 = vpop.eup %2515  ;;  %2533 = vpow2.f32 %v2011_v27  ;;  %v3007_v22 = vadd.f32 %v2929_v43, %v2989_v31  ;;  %v3070_v56 = vadd.f32 %v2979_v23, %v2917_v32 }
 0x13c   : > { %v2518_v38 = vpop.eup %2517  ;;  %2535 = vpow2.f32 %v2017_v40  ;;  %v746_v1 = vadd.f32 1.0, %v2516_v37  ;;  %v2049_v15 = vmul.f32 -1.442695, %v3057_v60 }
 0x13d   : > { %v2999_v42 = vpop.f32.mrb[16].mxu0  ;;  %2264 = vmatprep.mubr.msk.f32.mxu1 %vm566_vm2, %v784_v35  ;;  %v2520_v50 = vpop.eup %2519  ;;  %v786_v61 = vmul.f32 %v2518_v38, %v2901_v19  ;;  %2537 = vpow2.f32 %v2018_v45  ;;  %v3049_v38 = vadd.f32 %v2939_v49, %v2892_v13  ;;  %v2046_v45 = vmul.f32 -1.442695, %v3030_v21 }
 0x13e   : > { %v3003_v48 = vpop.f32.mrb[17].mxu0  ;;  %v2522_v55 = vpop.eup %2521  ;;  %v785_v36 = vmul.f32 %v2520_v50, %v2914_v30  ;;  %v2019_v30 = vmul.f32 -1.442695, %v3007_v22  ;;  %2539 = vpow2.f32 %v2020_v62  ;;  %v2051_v32 = vmul.f32 -1.442695, %v3070_v56 }
 0x13f   : > { %v3009_v54 = vpop.f32.mrb[18].mxu0  ;;  %v2524_v58 = vpop.eup %2523  ;;  %v742_v17 = vadd.f32 1.0, %v2522_v55  ;;  %2541 = vrcp.f32 %v746_v1  ;;  %v2048_v49 = vmul.f32 -1.442695, %v3049_v38 }
 0x140   : > { %v3012_v57 = vpop.f32.mrb[19].mxu0  ;;  %v2526_v0 = vpop.eup %2525  ;;  %2265 = vmatmul.mubr.msk.f32.vlgmr.msra.gmra.mrb[8].mxu1 %vm566_vm2, %v785_v36  ;;  %v787_v19 = vmul.f32 %v2524_v58, %v2910_v26  ;;  %2543 = vpow2.f32 %v2019_v30  ;;  %v2047_v58 = vmul.f32 -1.442695, %v3041_v11 }
 0x141   : > { %2267 = vmatprep.mubr.msk.f32.mxu1 %vm566_vm2, %v786_v61  ;;  %2417 = vmatpush3.bf16.msra.mxu1 %v2659_v10  ;;  %v743_v41 = vadd.f32 1.0, %v2526_v0  ;;  %2545 = vrcp.f32 %v742_v17  ;;  %v3064_v61 = vadd.f32 %v2973_v9, %v2894_v14 }
 0x142   : > { %v2528_v43 = vpop.eup %2527  ;;  %2418 = vmatprep.subr.bf16.mxu1 %v2659_v10 }
 0x143   : > { %v788_v18 = vmul.f32 %v2528_v43, %v2925_v39  ;;  %v2530_v27 = vpop.eup %2529  ;;  %v2021_v39 = vmul.f32 -1.442695, %v3021_v7  ;;  %2547 = vrcp.f32 %v743_v41  ;;  %v3074_v43 = vadd.f32 %v2969_v6, %v2898_v16 }
 0x144   : > { %v2532_v35 = vpop.eup %2531  ;;  %2268 = vmatmul.mubr.msk.f32.gmra.mrb[10].mxu1 %vm566_vm2, %v787_v19  ;;  %v744_v12 = vadd.f32 1.0, %v2530_v27  ;;  %v2050_v9 = vmul.f32 -1.442695, %v3064_v61  ;;  %v3081_v19 = vadd.f32 %v2976_v20, %v2931_v44 }
 0x145   : > { %v3033_v29 = vpop.f32.mrb[20].mxu0  ;;  %v2534_v26 = vpop.eup %2533  ;;  %2270 = vmatprep.mubr.msk.f32.mxu1 %vm566_vm2, %v788_v18  ;;  %2419 = vmatpush3.bf16.msra.mxu1 %v2659_v10  ;;  %v745_v55 = vadd.f32 1.0, %v2532_v35  ;;  %v2052_v16 = vmul.f32 -1.442695, %v3074_v43 }
 0x146   : > { %v3036_v37 = vpop.f32.mrb[21].mxu0  ;;  %v741_v40 = vadd.f32 1.0, %v2534_v26  ;;  %2420 = vmatprep.subr.bf16.mxu1 %v2659_v10  ;;  %v2536_v36 = vpop.eup %2535  ;;  %v2053_v20 = vmul.f32 -1.442695, %v3081_v19 }
 0x147   : > { %v3044_v52 = vpop.f32.mrb[22].mxu0  ;;  %v2538_v13 = vpop.eup %2537  ;;  %v747_v62 = vadd.f32 1.0, %v2536_v36 }
 0x148   : > { %v3052_v50 = vpop.f32.mrb[23].mxu0  ;;  %2549 = vrcp.f32 %v741_v40  ;;  %v2540_v0 = vpop.eup %2539  ;;  %v748_v1 = vadd.f32 1.0, %v2538_v13 }
 0x149   : > { %2551 = vpow2.f32 %v2021_v39  ;;  %2421 = vmatpush3.bf16.msra.mxu1 %v2659_v10  ;;  %v2542_v14 = vpop.eup %2541  ;;  %v750_v41 = vadd.f32 1.0, %v2540_v0  ;;  %v3093_v39 = vadd.f32 %v2999_v42, %v2934_v46 }
 0x14a   : > { %2553 = vpow2.f32 %v2046_v45  ;;  %2422 = vmatprep.subr.bf16.mxu1 %v2659_v10  ;;  %v2544_v30 = vpop.eup %2543 }
 0x14b   : > { %2555 = vrcp.f32 %v744_v12  ;;  %v2546_v23 = vpop.eup %2545  ;;  %v749_v18 = vadd.f32 1.0, %v2544_v30  ;;  %v2056_v36 = vmul.f32 -1.442695, %v3093_v39 }
 0x14c   : > { %2557 = vrcp.f32 %v745_v55  ;;  %v790_v44 = vmul.f32 %v2546_v23, %v2942_v51 }
 0x14d   : > { %2559 = vpow2.f32 %v2047_v58  ;;  %2423 = vmatpush3.bf16.msra.mxu1 %v2659_v10  ;;  %v2548_v17 = vpop.eup %2547  ;;  %v3086_v10 = vadd.f32 %v3003_v48, %v2919_v33  ;;  %v3098_v48 = vadd.f32 %v3012_v57, %v2946_v53  ;;  %v3107_v57 = vadd.f32 %v3009_v54, %v2964_v4 }
 0x14e   : > { %2561 = vpow2.f32 %v2048_v49  ;;  %v791_v46 = vmul.f32 %v2548_v17, %v2952_v59  ;;  %v3113_v49 = vadd.f32 %v3036_v37, %v2971_v8  ;;  %v794_v54 = vmul.f32 %v2542_v14, %v2937_v47 }
 0x14f   : > { %2563 = vpow2.f32 %v2049_v15  ;;  %v2054_v33 = vmul.f32 -1.442695, %v3086_v10  ;;  %v2055_v58 = vmul.f32 -1.442695, %v3098_v48  ;;  %v3121_v8 = vadd.f32 %v3052_v50, %v2989_v31 }
 0x150   : > { %2565 = vrcp.f32 %v747_v62  ;;  %v2058_v37 = vmul.f32 -1.442695, %v3113_v49 }
 0x151   : > { %2567 = vrcp.f32 %v748_v1 }
 0x152   : > { %v2550_v6 = vpop.eup %2549  ;;  %2569 = vpow2.f32 %v2050_v9  ;;  %v2057_v9 = vmul.f32 -1.442695, %v3107_v57 }
 0x153   : > { %v2552_v27 = vpop.eup %2551  ;;  %v789_v35 = vmul.f32 %v2550_v6, %v2967_v5  ;;  %2571 = vpow2.f32 %v2051_v32 }
 0x154   : > { %v2554_v26 = vpop.eup %2553  ;;  %2573 = vpow2.f32 %v2052_v16  ;;  %v751_v45 = vadd.f32 1.0, %v2552_v27 }
 0x155   : > { %v2556_v40 = vpop.eup %2555  ;;  %2271 = vmatmul.mubr.msk.f32.gmra.mrb[12].mxu1 %vm566_vm2, %v789_v35  ;;  %2575 = vrcp.f32 %v749_v18  ;;  %v1176_v42 = vadd.f32 1.0, %v2554_v26 }
 0x156   : > { %v2558_v5 = vpop.eup %2557  ;;  %2273 = vmatprep.mubr.msk.f32.mxu1 %vm566_vm2, %v790_v44  ;;  %2577 = vrcp.f32 %v750_v41  ;;  %v792_v55 = vmul.f32 %v2556_v40, %v2958_v63 }
 0x157   : > { %v2560_v51 = vpop.eup %2559  ;;  %2579 = vpow2.f32 %v2053_v20  ;;  %v793_v15 = vmul.f32 %v2558_v5, %v2961_v2  ;;  %v3126_v2 = vadd.f32 %v3033_v29, %v2991_v34  ;;  %v3134_v34 = vadd.f32 %v3044_v52, %v3016_v3 }
 0x158   : > { %v2562_v12 = vpop.eup %2561  ;;  %2581 = vpow2.f32 %v2054_v33  ;;  %v1177_v59 = vadd.f32 1.0, %v2560_v51  ;;  %v2059_v29 = vmul.f32 -1.442695, %v3121_v8 }
 0x159   : > { %v2564_v53 = vpop.eup %2563  ;;  %2274 = vmatmul.mubr.msk.f32.gmra.mrb[14].mxu1 %vm566_vm2, %v791_v46  ;;  %2583 = vrcp.f32 %v751_v45  ;;  %v1178_v62 = vadd.f32 1.0, %v2562_v12  ;;  %v2061_v52 = vmul.f32 -1.442695, %v3134_v34 }
 0x15a   : > { %v2566_v13 = vpop.eup %2565  ;;  %2276 = vmatprep.mubr.msk.f32.mxu1 %vm566_vm2, %v792_v55  ;;  %2585 = vrcp.f32 %v1176_v42  ;;  %v1179_v0 = vadd.f32 1.0, %v2564_v53 }
 0x15b   : > { %v2568_v63 = vpop.eup %2567  ;;  %2587 = vpow2.f32 %v2056_v36  ;;  %v795_v14 = vmul.f32 %v2566_v13, %v2983_v25  ;;  %v2060_v25 = vmul.f32 -1.442695, %v3126_v2 }
 0x15c   : > { %v2570_v4 = vpop.eup %2569  ;;  %2589 = vpow2.f32 %v2055_v58  ;;  %v796_v31 = vmul.f32 %v2568_v63, %v2987_v28 }
 0x15d   : > { %v2572_v1 = vpop.eup %2571  ;;  %2277 = vmatmul.mubr.msk.f32.gmra.mrb[16].mxu1 %vm566_vm2, %v793_v15  ;;  %2591 = vrcp.f32 %v1177_v59  ;;  %v1180_v30 = vadd.f32 1.0, %v2570_v4 }
 0x15e   : > { %2279 = vmatprep.mubr.msk.f32.mxu1 %vm566_vm2, %v794_v54  ;;  %v2574_v47 = vpop.eup %2573  ;;  %2593 = vrcp.f32 %v1178_v62  ;;  %v1181_v50 = vadd.f32 1.0, %v2572_v1 }
 0x15f   : > { %v2576_v32 = vpop.eup %2575  ;;  %2595 = vrcp.f32 %v1179_v0  ;;  %v1182_v6 = vadd.f32 1.0, %v2574_v47 }
 0x160   : > { %v2578_v23 = vpop.eup %2577  ;;  %2597 = vpow2.f32 %v2057_v9  ;;  %v797_v28 = vmul.f32 %v2576_v32, %v3007_v22 }
 0x161   : > { %2280 = vmatmul.mubr.msk.f32.gmra.mrb[18].mxu1 %vm566_vm2, %v795_v14  ;;  %v2580_v17 = vpop.eup %2579  ;;  %2599 = vpow2.f32 %v2058_v37  ;;  %v798_v27 = vmul.f32 %v2578_v23, %v2997_v24 }
 0x162   : > { %2282 = vmatprep.mubr.msk.f32.mxu1 %vm566_vm2, %v796_v31  ;;  %v2582_v16 = vpop.eup %2581  ;;  %2601 = vrcp.f32 %v1180_v30  ;;  %v1183_v35 = vadd.f32 1.0, %v2580_v17 }
 0x163   : > { %v2584_v18 = vpop.eup %2583  ;;  %2603 = vrcp.f32 %v1181_v50  ;;  %v1184_v44 = vadd.f32 1.0, %v2582_v16 }
 0x164   : > { %v2586_v3 = vpop.eup %2585  ;;  %2605 = vpow2.f32 %v2059_v29  ;;  %v799_v22 = vmul.f32 %v2584_v18, %v3021_v7 }
 0x165   : > { %2283 = vmatmul.mubr.msk.f32.gmra.mrb[20].mxu1 %vm566_vm2, %v797_v28  ;;  %v2588_v41 = vpop.eup %2587  ;;  %2607 = vpow2.f32 %v2060_v25  ;;  %v1224_v24 = vmul.f32 %v2586_v3, %v3030_v21 }
 0x166   : > { %2285 = vmatprep.mubr.msk.f32.mxu1 %vm566_vm2, %v798_v27  ;;  %v2590_v26 = vpop.eup %2589  ;;  %2609 = vrcp.f32 %v1182_v6  ;;  %v1186_v46 = vadd.f32 1.0, %v2588_v41 }
 0x167   : > { %v2592_v20 = vpop.eup %2591  ;;  %2611 = vpow2.f32 %v2061_v52  ;;  %v1185_v5 = vadd.f32 1.0, %v2590_v26 }
 0x168   : > { %v2594_v40 = vpop.eup %2593  ;;  %2613 = vrcp.f32 %v1183_v35  ;;  %v1225_v51 = vmul.f32 %v2592_v20, %v3041_v11 }
 0x169   : > { %2286 = vmatmul.mubr.msk.f32.gmra.mrb[22].mxu1 %vm566_vm2, %v799_v22  ;;  %v2596_v33 = vpop.eup %2595  ;;  %2615 = vrcp.f32 %v1184_v44  ;;  %v1226_v42 = vmul.f32 %v2594_v40, %v3049_v38 }
 0x16a   : > { %2328 = vmatprep.mubr.msk.f32.mxu1 %vm566_vm2, %v1224_v24  ;;  %v2598_v45 = vpop.eup %2597  ;;  %2617 = vrcp.f32 %v1185_v5  ;;  %v1227_v53 = vmul.f32 %v2596_v33, %v3057_v60 }
 0x16b   : > { %v2600_v7 = vpop.eup %2599  ;;  %v1187_v55 = vadd.f32 1.0, %v2598_v45  ;;  %2619 = vrcp.f32 %v1186_v46 }
 0x16c   : > { %v2602_v12 = vpop.eup %2601  ;;  %v1188_v58 = vadd.f32 1.0, %v2600_v7 }
 0x16d   : > { %2329 = vmatmul.mubr.msk.f32.vlgmr.msra.gmra.mrb[24].mxu1 %vm566_vm2, %v1225_v51  ;;  %v2604_v21 = vpop.eup %2603  ;;  %v1228_v11 = vmul.f32 %v2602_v12, %v3064_v61  ;;  %2621 = vrcp.f32 %v1187_v55 }
 0x16e   : > { %2331 = vmatprep.mubr.msk.f32.mxu1 %vm566_vm2, %v1226_v42  ;;  %v2606_v36 = vpop.eup %2605  ;;  %v1229_v15 = vmul.f32 %v2604_v21, %v3070_v56  ;;  %2623 = vrcp.f32 %v1188_v58 }
 0x16f   : > { %v2608_v13 = vpop.eup %2607  ;;  %v1189_v38 = vadd.f32 1.0, %v2606_v36 }
 0x170   : > { %v2610_v59 = vpop.eup %2609  ;;  %v1190_v62 = vadd.f32 1.0, %v2608_v13 }
 0x171   : > { %2332 = vmatmul.mubr.msk.f32.gmra.mrb[26].mxu1 %vm566_vm2, %v1227_v53  ;;  %v2612_v63 = vpop.eup %2611  ;;  %v1230_v60 = vmul.f32 %v2610_v59, %v3074_v43  ;;  %2625 = vrcp.f32 %v1189_v38 }
 0x172   : > { %2334 = vmatprep.mubr.msk.f32.mxu1 %vm566_vm2, %v1228_v11  ;;  %v2614_v4 = vpop.eup %2613  ;;  %v1191_v0 = vadd.f32 1.0, %v2612_v63  ;;  %2627 = vrcp.f32 %v1190_v62 }
 0x173   : > { %v2616_v54 = vpop.eup %2615  ;;  %v1231_v61 = vmul.f32 %v2614_v4, %v3081_v19 }
 0x174   : > { %v2618_v1 = vpop.eup %2617  ;;  %v1232_v9 = vmul.f32 %v2616_v54, %v3086_v10  ;;  %2629 = vrcp.f32 %v1191_v0 }
 0x175   : > { %2335 = vmatmul.mubr.msk.f32.gmra.mrb[28].mxu1 %vm566_vm2, %v1229_v15  ;;  %v2620_v37 = vpop.eup %2619  ;;  %v1233_v56 = vmul.f32 %v2618_v1, %v3098_v48 }
 0x176   : > { %2337 = vmatprep.mubr.msk.f32.mxu1 %vm566_vm2, %v1230_v60  ;;  %v1234_v47 = vmul.f32 %v2620_v37, %v3093_v39 }
 0x177   : > { %v2622_v43 = vpop.eup %2621 }
 0x178   : > { %v2624_v14 = vpop.eup %2623  ;;  %v1235_v19 = vmul.f32 %v2622_v43, %v3107_v57 }
 0x179   : > { %2338 = vmatmul.mubr.msk.f32.gmra.mrb[30].mxu1 %vm566_vm2, %v1231_v61  ;;  %v1236_v10 = vmul.f32 %v2624_v14, %v3113_v49 }
 0x17a   : > { %2340 = vmatprep.mubr.msk.f32.mxu1 %vm566_vm2, %v1232_v9 }
 0x17b   : > { %v2626_v30 = vpop.eup %2625 }
 0x17c   : > { %v2628_v32 = vpop.eup %2627  ;;  %v1237_v48 = vmul.f32 %v2626_v30, %v3121_v8 }
 0x17d   : > { %2341 = vmatmul.mubr.msk.f32.gmra.mrb[32].mxu1 %vm566_vm2, %v1233_v56  ;;  %v1238_v39 = vmul.f32 %v2628_v32, %v3126_v2 }
 0x17e   : > { %2343 = vmatprep.mubr.msk.f32.mxu1 %vm566_vm2, %v1234_v47  ;;  %v2630_v31 = vpop.eup %2629 }
 0x17f   : > { %v1239_v50 = vmul.f32 %v2630_v31, %v3134_v34 }
 0x181   : > { %2344 = vmatmul.mubr.msk.f32.gmra.mrb[34].mxu1 %vm566_vm2, %v1235_v19 }
 0x182   : > { %2346 = vmatprep.mubr.msk.f32.mxu1 %vm566_vm2, %v1236_v10 }
 0x185   : > { %2347 = vmatmul.mubr.msk.f32.gmra.mrb[36].mxu1 %vm566_vm2, %v1237_v48 }
 0x186   : > { %2349 = vmatprep.mubr.msk.f32.mxu1 %vm566_vm2, %v1238_v39 }
 0x189   : > { %2350 = vmatmul.mubr.msk.f32.gmra.mrb[38].mxu1 %vm566_vm2, %v1239_v50 }
 0x213   : > { %v2266_v57 = vpop.f32.mrb[8].mxu1 }
 0x214   : > { %v994_v49 = vmul.f32 0.015625, %v2266_v57  ;;  %v914_v23 = vpop.f32.mrb[9].mxu1  ;;  %v3210_v57 = vld [vmem:[%s2760_s23] sm:$0xff]  }
 0x215   : > { %v993_v29 = vmul.f32 0.015625, %v914_v23 }
 0x216   : > { %1011 = vst.msk [vmem:[#allocation3 + $0x8] sm:$0xff] %vm1009_vm3, %v994_v49  ;;  %v2083_v49 = vunpack.c.l.bf16 %v3210_v57 }
 0x217   : > { %1010 = vst.msk [vmem:[#allocation3] sm:$0xff] %vm1009_vm3, %v993_v29  ;;  %v2269_v8 = vpop.f32.mrb[10].mxu1 }
 0x218   : > { %v996_v17 = vmul.f32 0.015625, %v2269_v8  ;;  %v924_v2 = vpop.f32.mrb[11].mxu1  ;;  %2384 = vmatprep.mubr.f32.mxu0 %v2083_v49  ;;  %v1530_v49 = vld [vmem:[#allocation4] sm:$0xff] }
 0x219   : > { %v995_v25 = vmul.f32 0.015625, %v924_v2 }
 0x21a   : > { %1013 = vst.msk [vmem:[#allocation3 + $0x18] sm:$0xff] %vm1009_vm3, %v996_v17 }
 0x21b   : > { %1012 = vst.msk [vmem:[#allocation3 + $0x10] sm:$0xff] %vm1009_vm3, %v995_v25 }
 0x228   : > { %v2272_v34 = vpop.f32.mrb[12].mxu1 }
 0x229   : > { %v998_v16 = vmul.f32 0.015625, %v2272_v34  ;;  %v934_v28 = vpop.f32.mrb[13].mxu1 }
 0x22a   : > { %v997_v6 = vmul.f32 0.015625, %v934_v28 }
 0x22b   : > { %1015 = vst.msk [vmem:[#allocation3 + $0x28] sm:$0xff] %vm1009_vm3, %v998_v16 }
 0x22c   : > { %1014 = vst.msk [vmem:[#allocation3 + $0x20] sm:$0xff] %vm1009_vm3, %v997_v6  ;;  %v2275_v18 = vpop.f32.mrb[14].mxu1 }
 0x22d   : > { %v1000_v27 = vmul.f32 0.015625, %v2275_v18  ;;  %v944_v3 = vpop.f32.mrb[15].mxu1 }
 0x22e   : > { %v999_v52 = vmul.f32 0.015625, %v944_v3 }
 0x22f   : > { %1017 = vst.msk [vmem:[#allocation3 + $0x38] sm:$0xff] %vm1009_vm3, %v1000_v27 }
 0x230   : > { %1016 = vst.msk [vmem:[#allocation3 + $0x30] sm:$0xff] %vm1009_vm3, %v999_v52  ;;  %v2278_v41 = vpop.f32.mrb[16].mxu1 }
 0x231   : > { %v1002_v35 = vmul.f32 0.015625, %v2278_v41  ;;  %v954_v26 = vpop.f32.mrb[17].mxu1 }
 0x232   : > { %v1001_v22 = vmul.f32 0.015625, %v954_v26 }
 0x233   : > { %1019 = vst.msk [vmem:[#allocation3 + $0x48] sm:$0xff] %vm1009_vm3, %v1002_v35 }
 0x234   : > { %1018 = vst.msk [vmem:[#allocation3 + $0x40] sm:$0xff] %vm1009_vm3, %v1001_v22  ;;  %v2281_v44 = vpop.f32.mrb[18].mxu1 }
 0x235   : > { %v1004_v20 = vmul.f32 0.015625, %v2281_v44  ;;  %v964_v24 = vpop.f32.mrb[19].mxu1 }
 0x236   : > { %v1003_v40 = vmul.f32 0.015625, %v964_v24 }
 0x237   : > { %1021 = vst.msk [vmem:[#allocation3 + $0x58] sm:$0xff] %vm1009_vm3, %v1004_v20 }
 0x238   : > { %1020 = vst.msk [vmem:[#allocation3 + $0x50] sm:$0xff] %vm1009_vm3, %v1003_v40  ;;  %v2284_v33 = vpop.f32.mrb[20].mxu1 }
 0x239   : > { %v1006_v5 = vmul.f32 0.015625, %v2284_v33  ;;  %v974_v45 = vpop.f32.mrb[21].mxu1 }
 0x23a   : > { %v1005_v51 = vmul.f32 0.015625, %v974_v45 }
 0x23b   : > { %1023 = vst.msk [vmem:[#allocation3 + $0x68] sm:$0xff] %vm1009_vm3, %v1006_v5 }
 0x23c   : > { %1022 = vst.msk [vmem:[#allocation3 + $0x60] sm:$0xff] %vm1009_vm3, %v1005_v51  ;;  %v2287_v46 = vpop.f32.mrb[22].mxu1 }
 0x23d   : > { %v1008_v7 = vmul.f32 0.015625, %v2287_v46  ;;  %v984_v42 = vpop.f32.mrb[23].mxu1 }
 0x23e   : > { %v1007_v12 = vmul.f32 0.015625, %v984_v42 }
 0x23f   : > { %1025 = vst.msk [vmem:[#allocation3 + $0x78] sm:$0xff] %vm1009_vm3, %v1008_v7 }
 0x240   : > { %1024 = vst.msk [vmem:[#allocation3 + $0x70] sm:$0xff] %vm1009_vm3, %v1007_v12  ;;  %v2330_v21 = vpop.f32.mrb[24].mxu1 }
 0x241   : > { %v1434_v55 = vmul.f32 0.015625, %v2330_v21  ;;  %v1354_v36 = vpop.f32.mrb[25].mxu1 }
 0x242   : > { %v1433_v53 = vmul.f32 0.015625, %v1354_v36 }
 0x243   : > { %1467 = vrot.lane.b32.xlu1 %v1434_v55, %s2660_s15 }
 0x244   : > { %1465 = vrot.lane.b32.xlu0 %v1433_v53, %s2660_s15  ;;  %v2333_v58 = vpop.f32.mrb[26].mxu1 }
 0x245   : > { %v1436_v13 = vmul.f32 0.015625, %v2333_v58  ;;  %v1364_v11 = vpop.f32.mrb[27].mxu1 }
 0x246   : > { %v1435_v59 = vmul.f32 0.015625, %v1364_v11 }
 0x247   : > { %1471 = vrot.lane.b32.xlu1 %v1436_v13, %s2660_s15 }
 0x248   : > { %1469 = vrot.lane.b32.xlu0 %v1435_v59, %s2660_s15  ;;  %v2336_v38 = vpop.f32.mrb[28].mxu1 }
 0x249   : > { %v1438_v63 = vmul.f32 0.015625, %v2336_v38  ;;  %v1374_v15 = vpop.f32.mrb[29].mxu1 }
 0x24a   : > { %v1437_v62 = vmul.f32 0.015625, %v1374_v15  ;;  %v2113_v15 = vld [vmem:[%s2760_s23 + $0x8] sm:$0xff]  }
 0x24b   : > { %1475 = vrot.lane.b32.xlu1 %v1438_v63, %s2660_s15 }
 0x24c   : > { %1473 = vrot.lane.b32.xlu0 %v1437_v62, %s2660_s15  ;;  %v2339_v4 = vpop.f32.mrb[30].mxu1  ;;  %v2084_v62 = vunpack.c.h.bf16 %v3210_v57  ;;  %v1531_v57 = vld [vmem:[#allocation4 + $0x8] sm:$0xff] }
 0x24d   : > { %v1440_v60 = vmul.f32 0.015625, %v2339_v4  ;;  %v1384_v54 = vpop.f32.mrb[31].mxu1  ;;  %v2087_v4 = vunpack.c.l.bf16 %v2113_v15 }
 0x24e   : > { %v1439_v0 = vmul.f32 0.015625, %v1384_v54  ;;  %v2088_v54 = vunpack.c.h.bf16 %v2113_v15  ;;  %v1545_v15 = vld [vmem:[#allocation4 + $0x78] sm:$0xff] }
 0x24f   : > { %1479 = vrot.lane.b32.xlu1 %v1440_v60, %s2660_s15  ;;  %v2114_v60 = vld [vmem:[%s2760_s23 + $0x10] sm:$0xff]  }
 0x250   : > { %1477 = vrot.lane.b32.xlu0 %v1439_v0, %s2660_s15  ;;  %v2342_v61 = vpop.f32.mrb[32].mxu1  ;;  %v2091_v0 = vunpack.c.l.bf16 %v2114_v60 }
 0x251   : > { %v1442_v1 = vmul.f32 0.015625, %v2342_v61  ;;  %v1394_v9 = vpop.f32.mrb[33].mxu1  ;;  %v2115_v61 = vld [vmem:[%s2760_s23 + $0x18] sm:$0xff]  }
 0x252   : > { %v1441_v37 = vmul.f32 0.015625, %v1394_v9  ;;  %v2095_v9 = vunpack.c.l.bf16 %v2115_v61 }
 0x253   : > { %1483 = vrot.lane.b32.xlu1 %v1442_v1, %s2660_s15  ;;  %v2092_v1 = vunpack.c.h.bf16 %v2114_v60 }
 0x254   : > { %1481 = vrot.lane.b32.xlu0 %v1441_v37, %s2660_s15  ;;  %v2345_v56 = vpop.f32.mrb[34].mxu1  ;;  %v2116_v37 = vld [vmem:[%s2760_s23 + $0x20] sm:$0xff]  }
 0x255   : > { %v1444_v43 = vmul.f32 0.015625, %v2345_v56  ;;  %v1404_v47 = vpop.f32.mrb[35].mxu1  ;;  %v2096_v56 = vunpack.c.h.bf16 %v2115_v61  ;;  %v1794_v61 = vld [vmem:[%s3382_s4 + $0x10] sm:$0xff] (!%p2078_p10) }
 0x256   : > { %v1443_v14 = vmul.f32 0.015625, %v1404_v47  ;;  %v2117_v47 = vld [vmem:[%s2760_s23 + $0x28] sm:$0xff]  }
 0x257   : > { %1487 = vrot.lane.b32.xlu1 %v1444_v43, %s2660_s15  ;;  %v2099_v43 = vunpack.c.l.bf16 %v2116_v37 }
 0x258   : > { %1485 = vrot.lane.b32.xlu0 %v1443_v14, %s2660_s15  ;;  %v2348_v19 = vpop.f32.mrb[36].mxu1  ;;  %v2100_v14 = vunpack.c.h.bf16 %v2116_v37  ;;  %v1795_v37 = vld [vmem:[%s3382_s4 + $0x18] sm:$0xff] (!%p2078_p10) }
 0x259   : > { %v1446_v30 = vmul.f32 0.015625, %v2348_v19  ;;  %v1414_v10 = vpop.f32.mrb[37].mxu1  ;;  %v2103_v19 = vunpack.c.l.bf16 %v2117_v47 }
 0x25a   : > { %v1445_v32 = vmul.f32 0.015625, %v1414_v10  ;;  %v2104_v10 = vunpack.c.h.bf16 %v2117_v47  ;;  %v1796_v47 = vld [vmem:[%s3382_s4 + $0x20] sm:$0xff] (!%p2078_p10) }
 0x25b   : > { %1491 = vrot.lane.b32.xlu1 %v1446_v30, %s2660_s15  ;;  %v2118_v30 = vld [vmem:[%s2760_s23 + $0x30] sm:$0xff]  }
 0x25c   : > { %1489 = vrot.lane.b32.xlu0 %v1445_v32, %s2660_s15  ;;  %v2351_v48 = vpop.f32.mrb[38].mxu1  ;;  %v2107_v32 = vunpack.c.l.bf16 %v2118_v30 }
 0x25d   : > { %v1448_v31 = vmul.f32 0.015625, %v2351_v48  ;;  %v1424_v39 = vpop.f32.mrb[39].mxu1  ;;  %v2119_v48 = vld [vmem:[%s2760_s23 + $0x38] sm:$0xff]  }
 0x25e   : > { %v1447_v50 = vmul.f32 0.015625, %v1424_v39  ;;  %v2111_v39 = vunpack.c.l.bf16 %v2119_v48 }
 0x25f   : > { %1495 = vrot.lane.b32.xlu1 %v1448_v31, %s2660_s15  ;;  %v2108_v31 = vunpack.c.h.bf16 %v2118_v30  ;;  %v1801_v30 = vld [vmem:[%s3382_s4 + $0x48] sm:$0xff] (!%p2078_p10) }
 0x260   : > { %1493 = vrot.lane.b32.xlu0 %v1447_v50, %s2660_s15  ;;  %v2112_v50 = vunpack.c.h.bf16 %v2119_v48  ;;  %v1802_v48 = vld [vmem:[%s3382_s4 + $0x50] sm:$0xff] (!%p2078_p10) }
 0x2b5   : > { %v1468_v23 = vpop.permute.xlu1 %1467 }
 0x2b6   : > { %1515 = vst.msk [vmem:[#allocation3 + $0x8] sm:$0xff] %vm1513_vm4, %v1468_v23  ;;  %v1466_v29 = vpop.permute.xlu0 %1465 }
 0x2b7   : > { %1514 = vst.msk [vmem:[#allocation3] sm:$0xff] %vm1513_vm4, %v1466_v29 }
 0x2b9   : > { %v1472_v8 = vpop.permute.xlu1 %1471 }
 0x2ba   : > { %1517 = vst.msk [vmem:[#allocation3 + $0x18] sm:$0xff] %vm1513_vm4, %v1472_v8  ;;  %v1470_v17 = vpop.permute.xlu0 %1469 }
 0x2bb   : > { %1516 = vst.msk [vmem:[#allocation3 + $0x10] sm:$0xff] %vm1513_vm4, %v1470_v17 }
 0x2bd   : > { %v1476_v2 = vpop.permute.xlu1 %1475  ;;  %v1579_v25 = vld [vmem:[#allocation3 + $0x8] sm:$0xff] }
 0x2be   : > { %1519 = vst.msk [vmem:[#allocation3 + $0x28] sm:$0xff] %vm1513_vm4, %v1476_v2  ;;  %v1474_v34 = vpop.permute.xlu0 %1473  ;;  %v1578_v16 = vld [vmem:[#allocation3] sm:$0xff]  ;;  %v1533_v2 = vld [vmem:[#allocation4 + $0x18] sm:$0xff] }
 0x2bf   : > { %1518 = vst.msk [vmem:[#allocation3 + $0x20] sm:$0xff] %vm1513_vm4, %v1474_v34  ;;  %v2424_v28 = vpack.c.bf16 %v1579_v25, %v1578_v16  ;;  %v1532_v25 = vld [vmem:[#allocation4 + $0x10] sm:$0xff] }
 0x2c1   : > { %2425 = vmatprep.subr.bf16.mxu0 %v2424_v28  ;;  %v1480_v6 = vpop.permute.xlu1 %1479  ;;  %v1581_v18 = vld [vmem:[#allocation3 + $0x18] sm:$0xff] }
 0x2c2   : > { %1521 = vst.msk [vmem:[#allocation3 + $0x38] sm:$0xff] %vm1513_vm4, %v1480_v6  ;;  %2427 = vmatpush3.bf16.msra.mxu0 %v2424_v28  ;;  %v1478_v27 = vpop.permute.xlu0 %1477  ;;  %v1580_v3 = vld [vmem:[#allocation3 + $0x10] sm:$0xff] }
 0x2c3   : > { %1520 = vst.msk [vmem:[#allocation3 + $0x30] sm:$0xff] %vm1513_vm4, %v1478_v27  ;;  %v2428_v52 = vpack.c.bf16 %v1581_v18, %v1580_v3  ;;  %v1535_v18 = vld [vmem:[#allocation4 + $0x28] sm:$0xff]  ;;  %v1534_v27 = vld [vmem:[#allocation4 + $0x20] sm:$0xff] }
 0x2c5   : > { %2429 = vmatprep.subr.bf16.mxu0 %v2428_v52  ;;  %v1484_v41 = vpop.permute.xlu1 %1483  ;;  %v1583_v35 = vld [vmem:[#allocation3 + $0x28] sm:$0xff] }
 0x2c6   : > { %1523 = vst.msk [vmem:[#allocation3 + $0x48] sm:$0xff] %vm1513_vm4, %v1484_v41  ;;  %2431 = vmatpush3.bf16.msra.mxu0 %v2428_v52  ;;  %v1482_v26 = vpop.permute.xlu0 %1481  ;;  %v1582_v22 = vld [vmem:[#allocation3 + $0x20] sm:$0xff] }
 0x2c7   : > { %1522 = vst.msk [vmem:[#allocation3 + $0x40] sm:$0xff] %vm1513_vm4, %v1482_v26  ;;  %v2432_v44 = vpack.c.bf16 %v1583_v35, %v1582_v22  ;;  %v1537_v26 = vld [vmem:[#allocation4 + $0x38] sm:$0xff]  ;;  %v1536_v22 = vld [vmem:[#allocation4 + $0x30] sm:$0xff] }
 0x2c9   : > { %2433 = vmatprep.subr.bf16.mxu0 %v2432_v44  ;;  %v1488_v20 = vpop.permute.xlu1 %1487  ;;  %v1585_v24 = vld [vmem:[#allocation3 + $0x38] sm:$0xff] }
 0x2ca   : > { %1525 = vst.msk [vmem:[#allocation3 + $0x58] sm:$0xff] %vm1513_vm4, %v1488_v20  ;;  %2435 = vmatpush3.bf16.msra.mxu0 %v2432_v44  ;;  %v1486_v40 = vpop.permute.xlu0 %1485  ;;  %v1584_v33 = vld [vmem:[#allocation3 + $0x30] sm:$0xff] }
 0x2cb   : > { %1524 = vst.msk [vmem:[#allocation3 + $0x50] sm:$0xff] %vm1513_vm4, %v1486_v40  ;;  %v2436_v5 = vpack.c.bf16 %v1585_v24, %v1584_v33  ;;  %v1539_v33 = vld [vmem:[#allocation4 + $0x48] sm:$0xff] }
 0x2cd   : > { %2437 = vmatprep.subr.bf16.mxu0 %v2436_v5  ;;  %v1492_v45 = vpop.permute.xlu1 %1491  ;;  %v1587_v51 = vld [vmem:[#allocation3 + $0x48] sm:$0xff] }
 0x2ce   : > { %1527 = vst.msk [vmem:[#allocation3 + $0x68] sm:$0xff] %vm1513_vm4, %v1492_v45  ;;  %2439 = vmatpush3.bf16.msra.mxu0 %v2436_v5  ;;  %v1490_v46 = vpop.permute.xlu0 %1489  ;;  %v1586_v7 = vld [vmem:[#allocation3 + $0x40] sm:$0xff] }
 0x2cf   : > { %1526 = vst.msk [vmem:[#allocation3 + $0x60] sm:$0xff] %vm1513_vm4, %v1490_v46  ;;  %v2440_v42 = vpack.c.bf16 %v1587_v51, %v1586_v7  ;;  %v1538_v5 = vld [vmem:[#allocation4 + $0x40] sm:$0xff] }
 0x2d1   : > { %2441 = vmatprep.subr.bf16.mxu0 %v2440_v42  ;;  %v1496_v12 = vpop.permute.xlu1 %1495  ;;  %v1589_v21 = vld [vmem:[#allocation3 + $0x58] sm:$0xff] }
 0x2d2   : > { %1529 = vst.msk [vmem:[#allocation3 + $0x78] sm:$0xff] %vm1513_vm4, %v1496_v12  ;;  %2443 = vmatpush3.bf16.msra.mxu0 %v2440_v42  ;;  %v1494_v55 = vpop.permute.xlu0 %1493  ;;  %v1588_v36 = vld [vmem:[#allocation3 + $0x50] sm:$0xff]  ;;  %v1541_v42 = vld [vmem:[#allocation4 + $0x58] sm:$0xff] }
 0x2d3   : > { %1528 = vst.msk [vmem:[#allocation3 + $0x70] sm:$0xff] %vm1513_vm4, %v1494_v55  ;;  %v2444_v53 = vpack.c.bf16 %v1589_v21, %v1588_v36  ;;  %v1540_v12 = vld [vmem:[#allocation4 + $0x50] sm:$0xff] }
 0x2d5   : > { %2445 = vmatprep.subr.bf16.mxu0 %v2444_v53  ;;  %v1591_v58 = vld [vmem:[#allocation3 + $0x68] sm:$0xff] }
 0x2d6   : > { %2447 = vmatpush3.bf16.msra.mxu0 %v2444_v53  ;;  %v1590_v13 = vld [vmem:[#allocation3 + $0x60] sm:$0xff] }
 0x2d7   : > { %v2448_v11 = vpack.c.bf16 %v1591_v58, %v1590_v13  ;;  %v1543_v58 = vld [vmem:[#allocation4 + $0x68] sm:$0xff]  ;;  %v1542_v13 = vld [vmem:[#allocation4 + $0x60] sm:$0xff] }
 0x2d9   : > { %2449 = vmatprep.subr.bf16.mxu0 %v2448_v11  ;;  %v1593_v59 = vld [vmem:[#allocation3 + $0x78] sm:$0xff] }
 0x2da   : > { %2451 = vmatpush3.bf16.msra.mxu0 %v2448_v11  ;;  %v1592_v38 = vld [vmem:[#allocation3 + $0x70] sm:$0xff] }
 0x2db   : > { %v2452_v63 = vpack.c.bf16 %v1593_v59, %v1592_v38 }
 0x2dd   : > { %2453 = vmatprep.subr.bf16.mxu0 %v2452_v63 }
 0x2de   : > { %2455 = vmatpush3.bf16.msra.mxu0 %v2452_v63 }
 0x2e1   : > { %2385 = vmatmul.mubr.f32.vlgmr.msra.gmra.mrb[24].mxu0 %v2084_v62  ;;  %v1544_v62 = vld [vmem:[#allocation4 + $0x70] sm:$0xff] }
 0x2e2   : > { %2387 = vmatprep.mubr.f32.mxu0 %v2087_v4 }
 0x2e5   : > { %2388 = vmatmul.mubr.f32.gmra.mrb[26].mxu0 %v2088_v54 }
 0x2e6   : > { %2390 = vmatprep.mubr.f32.mxu0 %v2091_v0 }
 0x2e9   : > { %2391 = vmatmul.mubr.f32.gmra.mrb[28].mxu0 %v2092_v1  ;;  %v1792_v1 = vld [vmem:[%s3382_s4] sm:$0xff] (!%p2078_p10) }
 0x2ea   : > { %2393 = vmatprep.mubr.f32.mxu0 %v2095_v9  ;;  %v2661_v9 = vmov (!%p2078_p10), 0  }
 0x2eb   : > { %2632 = vset.pattern.permute.xlu1 (!%p2078_p10), %v2661_v9  ;;  %2631 = vset.pattern.permute.xlu0 (!%p2078_p10), %v2661_v9 }
 0x2ec   : > { %1820 = vperm.xlu1 (!%p2078_p10), %2632, %v1794_v61   ;;  %1810 = vperm.xlu0 (!%p2078_p10), %2631, %v1792_v1  }
 0x2ed   : > { %2394 = vmatmul.mubr.f32.gmra.mrb[30].mxu0 %v2096_v56  ;;  %v1793_v56 = vld [vmem:[%s3382_s4 + $0x8] sm:$0xff] (!%p2078_p10) }
 0x2ee   : > { %2396 = vmatprep.mubr.f32.mxu0 %v2099_v43  ;;  %v1797_v43 = vld [vmem:[%s3382_s4 + $0x28] sm:$0xff] (!%p2078_p10) }
 0x2f0   : > { %1825 = vperm.xlu1 (!%p2078_p10), %2632, %v1795_v37   ;;  %1815 = vperm.xlu0 (!%p2078_p10), %2631, %v1793_v56  }
 0x2f1   : > { %2397 = vmatmul.mubr.f32.gmra.mrb[32].mxu0 %v2100_v14  ;;  %v1799_v14 = vld [vmem:[%s3382_s4 + $0x38] sm:$0xff] (!%p2078_p10) }
 0x2f2   : > { %2399 = vmatprep.mubr.f32.mxu0 %v2103_v19  ;;  %v1798_v19 = vld [vmem:[%s3382_s4 + $0x30] sm:$0xff] (!%p2078_p10) }
 0x2f4   : > { %1835 = vperm.xlu1 (!%p2078_p10), %2632, %v1797_v43   ;;  %1830 = vperm.xlu0 (!%p2078_p10), %2631, %v1796_v47  }
 0x2f5   : > { %2400 = vmatmul.mubr.f32.gmra.mrb[34].mxu0 %v2104_v10  ;;  %v1800_v10 = vld [vmem:[%s3382_s4 + $0x40] sm:$0xff] (!%p2078_p10) }
 0x2f6   : > { %2402 = vmatprep.mubr.f32.mxu0 %v2107_v32  ;;  %v1803_v32 = vld [vmem:[%s3382_s4 + $0x58] sm:$0xff] (!%p2078_p10) }
 0x2f8   : > { %1845 = vperm.xlu1 (!%p2078_p10), %2632, %v1799_v14   ;;  %1840 = vperm.xlu0 (!%p2078_p10), %2631, %v1798_v19  }
 0x2f9   : > { %2403 = vmatmul.mubr.f32.gmra.mrb[36].mxu0 %v2108_v31  ;;  %v1805_v31 = vld [vmem:[%s3382_s4 + $0x68] sm:$0xff] (!%p2078_p10) }
 0x2fa   : > { %2405 = vmatprep.mubr.f32.mxu0 %v2111_v39  ;;  %v1804_v39 = vld [vmem:[%s3382_s4 + $0x60] sm:$0xff] (!%p2078_p10) }
 0x2fc   : > { %1855 = vperm.xlu1 (!%p2078_p10), %2632, %v1801_v30   ;;  %1850 = vperm.xlu0 (!%p2078_p10), %2631, %v1800_v10  }
 0x2fd   : > { %2406 = vmatmul.mubr.f32.gmra.mrb[38].mxu0 %v2112_v50  ;;  %v1807_v50 = vld [vmem:[%s3382_s4 + $0x78] sm:$0xff] (!%p2078_p10) }
 0x300   : > { %1865 = vperm.xlu1 (!%p2078_p10), %2632, %v1803_v32   ;;  %1860 = vperm.xlu0 (!%p2078_p10), %2631, %v1802_v48  }
 0x304   : > { %1875 = vperm.xlu1 (!%p2078_p10), %2632, %v1805_v31   ;;  %1870 = vperm.xlu0 (!%p2078_p10), %2631, %v1804_v39  }
 0x308   : > { %1885 = vperm.xlu1 (!%p2078_p10), %2632, %v1807_v50  }
 0x3b4   : > { %v2386_v23 = vpop.f32.mrb[24].mxu0 }
 0x3b5   : > { %v1740_v29 = vadd.f32 %v2386_v23, %v1531_v57  ;;  %v1660_v8 = vpop.f32.mrb[25].mxu0  ;;  %v1806_v57 = vld [vmem:[%s3382_s4 + $0x70] sm:$0xff] (!%p2078_p10) }
 0x3b6   : > { %v1739_v17 = vadd.f32 %v1660_v8, %v1530_v49  ;;  %1880 = vperm.xlu0 (!%p2078_p10), %2631, %v1806_v57   ;;  %v1811_v8 = vpop.permute.xlu0 (!%p2078_p10), %1810 }
 0x3b7   : > { %1757 = vst.msk [vmem:[#allocation4 + $0x8] sm:$0xff] %vm1755_vm5, %v1740_v29  ;;  %v1821_v29 = vpop.permute.xlu1 (!%p2078_p10), %1820 }
 0x3b8   : > { %1756 = vst.msk [vmem:[#allocation4] sm:$0xff] %vm1755_vm5, %v1739_v17  ;;  %v2389_v34 = vpop.f32.mrb[26].mxu0 }
 0x3b9   : > { %v1742_v16 = vadd.f32 %v2389_v34, %v1533_v2  ;;  %v1670_v28 = vpop.f32.mrb[27].mxu0 }
 0x3ba   : > { %v1741_v6 = vadd.f32 %v1670_v28, %v1532_v25  ;;  %v1816_v28 = vpop.permute.xlu0 (!%p2078_p10), %1815 }
 0x3bb   : > { %1759 = vst.msk [vmem:[#allocation4 + $0x18] sm:$0xff] %vm1755_vm5, %v1742_v16  ;;  %v1826_v16 = vpop.permute.xlu1 (!%p2078_p10), %1825 }
 0x3bc   : > { %1758 = vst.msk [vmem:[#allocation4 + $0x10] sm:$0xff] %vm1755_vm5, %v1741_v6  ;;  %v2392_v3 = vpop.f32.mrb[28].mxu0 }
 0x3bd   : > { %v1744_v52 = vadd.f32 %v2392_v3, %v1535_v18  ;;  %v1680_v41 = vpop.f32.mrb[29].mxu0 }
 0x3be   : > { %v1743_v35 = vadd.f32 %v1680_v41, %v1534_v27  ;;  %v1777_v34 = vld [vmem:[#allocation4 + $0x8] sm:$0xff] (!%p2078_p10)  ;;  %v1831_v41 = vpop.permute.xlu0 (!%p2078_p10), %1830 }
 0x3bf   : > { %1761 = vst.msk [vmem:[#allocation4 + $0x28] sm:$0xff] %vm1755_vm5, %v1744_v52  ;;  %v1776_v23 = vld [vmem:[#allocation4] sm:$0xff] (!%p2078_p10)  ;;  %v1889_v18 = vadd.f32 (!%p2078_p10), %v1816_v28, %v1777_v34  ;;  %v1836_v52 = vpop.permute.xlu1 (!%p2078_p10), %1835 }
 0x3c0   : > { %1760 = vst.msk [vmem:[#allocation4 + $0x20] sm:$0xff] %vm1755_vm5, %v1743_v35  ;;  %v2395_v44 = vpop.f32.mrb[30].mxu0  ;;  %v1888_v2 = vadd.f32 (!%p2078_p10), %v1811_v8, %v1776_v23 }
 0x3c1   : > { %v1746_v20 = vadd.f32 %v2395_v44, %v1537_v26  ;;  %v1690_v24 = vpop.f32.mrb[31].mxu0  ;;  %1905 = vst.msk [vmem:[%s3383_s5 + $0x8] sm:$0xff] (!%p2078_p10), %vm1755_vm5, %v1889_v18 }
 0x3c2   : > { %v1745_v40 = vadd.f32 %v1690_v24, %v1536_v22  ;;  %v1779_v25 = vld [vmem:[#allocation4 + $0x18] sm:$0xff] (!%p2078_p10)  ;;  %1904 = vst.msk [vmem:[%s3383_s5] sm:$0xff] (!%p2078_p10), %vm1755_vm5, %v1888_v2  ;;  %v1841_v24 = vpop.permute.xlu0 (!%p2078_p10), %1840 }
 0x3c3   : > { %1763 = vst.msk [vmem:[#allocation4 + $0x38] sm:$0xff] %vm1755_vm5, %v1746_v20  ;;  %v1778_v49 = vld [vmem:[#allocation4 + $0x10] sm:$0xff] (!%p2078_p10)  ;;  %v1891_v6 = vadd.f32 (!%p2078_p10), %v1826_v16, %v1779_v25  ;;  %v1846_v20 = vpop.permute.xlu1 (!%p2078_p10), %1845 }
 0x3c4   : > { %1762 = vst.msk [vmem:[#allocation4 + $0x30] sm:$0xff] %vm1755_vm5, %v1745_v40  ;;  %v2398_v45 = vpop.f32.mrb[32].mxu0  ;;  %v1890_v17 = vadd.f32 (!%p2078_p10), %v1821_v29, %v1778_v49 }
 0x3c5   : > { %v1748_v51 = vadd.f32 %v2398_v45, %v1539_v33  ;;  %v1700_v46 = vpop.f32.mrb[33].mxu0  ;;  %1907 = vst.msk [vmem:[%s3383_s5 + $0x18] sm:$0xff] (!%p2078_p10), %vm1755_vm5, %v1891_v6 }
 0x3c6   : > { %v1747_v7 = vadd.f32 %v1700_v46, %v1538_v5  ;;  %1906 = vst.msk [vmem:[%s3383_s5 + $0x10] sm:$0xff] (!%p2078_p10), %vm1755_vm5, %v1890_v17  ;;  %v1781_v27 = vld [vmem:[#allocation4 + $0x28] sm:$0xff] (!%p2078_p10)  ;;  %v1851_v46 = vpop.permute.xlu0 (!%p2078_p10), %1850 }
 0x3c7   : > { %1765 = vst.msk [vmem:[#allocation4 + $0x48] sm:$0xff] %vm1755_vm5, %v1748_v51  ;;  %v1780_v3 = vld [vmem:[#allocation4 + $0x20] sm:$0xff] (!%p2078_p10)  ;;  %v1893_v35 = vadd.f32 (!%p2078_p10), %v1836_v52, %v1781_v27  ;;  %v1856_v51 = vpop.permute.xlu1 (!%p2078_p10), %1855 }
 0x3c8   : > { %1764 = vst.msk [vmem:[#allocation4 + $0x40] sm:$0xff] %vm1755_vm5, %v1747_v7  ;;  %v2401_v21 = vpop.f32.mrb[34].mxu0  ;;  %v1892_v26 = vadd.f32 (!%p2078_p10), %v1831_v41, %v1780_v3 }
 0x3c9   : > { %v1750_v55 = vadd.f32 %v2401_v21, %v1541_v42  ;;  %v1710_v36 = vpop.f32.mrb[35].mxu0  ;;  %1909 = vst.msk [vmem:[%s3383_s5 + $0x28] sm:$0xff] (!%p2078_p10), %vm1755_vm5, %v1893_v35 }
 0x3ca   : > { %v1749_v53 = vadd.f32 %v1710_v36, %v1540_v12  ;;  %v1783_v22 = vld [vmem:[#allocation4 + $0x38] sm:$0xff] (!%p2078_p10)  ;;  %1908 = vst.msk [vmem:[%s3383_s5 + $0x20] sm:$0xff] (!%p2078_p10), %vm1755_vm5, %v1892_v26  ;;  %v1861_v36 = vpop.permute.xlu0 (!%p2078_p10), %1860 }
 0x3cb   : > { %1767 = vst.msk [vmem:[#allocation4 + $0x58] sm:$0xff] %vm1755_vm5, %v1750_v55  ;;  %v1782_v44 = vld [vmem:[#allocation4 + $0x30] sm:$0xff] (!%p2078_p10)  ;;  %v1895_v40 = vadd.f32 (!%p2078_p10), %v1846_v20, %v1783_v22  ;;  %v1866_v55 = vpop.permute.xlu1 (!%p2078_p10), %1865 }
 0x3cc   : > { %1766 = vst.msk [vmem:[#allocation4 + $0x50] sm:$0xff] %vm1755_vm5, %v1749_v53  ;;  %v2404_v11 = vpop.f32.mrb[36].mxu0  ;;  %v1894_v33 = vadd.f32 (!%p2078_p10), %v1841_v24, %v1782_v44 }
 0x3cd   : > { %v1752_v59 = vadd.f32 %v2404_v11, %v1543_v58  ;;  %v1720_v38 = vpop.f32.mrb[37].mxu0  ;;  %1911 = vst.msk [vmem:[%s3383_s5 + $0x38] sm:$0xff] (!%p2078_p10), %vm1755_vm5, %v1895_v40 }
 0x3ce   : > { %v1751_v63 = vadd.f32 %v1720_v38, %v1542_v13  ;;  %1775 = sbr.rel (%p2078_p10) target bundleno = 1081 (0x439), region = 89  ;;  %v1785_v5 = vld [vmem:[#allocation4 + $0x48] sm:$0xff] (!%p2078_p10)  ;;  %1910 = vst.msk [vmem:[%s3383_s5 + $0x30] sm:$0xff] (!%p2078_p10), %vm1755_vm5, %v1894_v33  ;;  %v1871_v38 = vpop.permute.xlu0 (!%p2078_p10), %1870 }
 0x3cf   : > { %1769 = vst.msk [vmem:[#allocation4 + $0x68] sm:$0xff] %vm1755_vm5, %v1752_v59  ;;  %v1784_v45 = vld [vmem:[#allocation4 + $0x40] sm:$0xff] (!%p2078_p10)  ;;  %v1897_v7 = vadd.f32 (!%p2078_p10), %v1856_v51, %v1785_v5  ;;  %v1876_v59 = vpop.permute.xlu1 (!%p2078_p10), %1875 }
 0x3d0   : > { %1768 = vst.msk [vmem:[#allocation4 + $0x60] sm:$0xff] %vm1755_vm5, %v1751_v63  ;;  %v2407_v4 = vpop.f32.mrb[38].mxu0  ;;  %v1896_v42 = vadd.f32 (!%p2078_p10), %v1851_v46, %v1784_v45 }
 0x3d1   : > { %v1754_v60 = vadd.f32 %v2407_v4, %v1545_v15  ;;  %v1730_v54 = vpop.f32.mrb[39].mxu0  ;;  %1913 = vst.msk [vmem:[%s3383_s5 + $0x48] sm:$0xff] (!%p2078_p10), %vm1755_vm5, %v1897_v7 }
 0x3d2   : > { %v1753_v0 = vadd.f32 %v1730_v54, %v1544_v62  ;;  %v1787_v12 = vld [vmem:[#allocation4 + $0x58] sm:$0xff] (!%p2078_p10)  ;;  %1912 = vst.msk [vmem:[%s3383_s5 + $0x40] sm:$0xff] (!%p2078_p10), %vm1755_vm5, %v1896_v42 }
 0x3d3   : > { %1771 = vst.msk [vmem:[#allocation4 + $0x78] sm:$0xff] %vm1755_vm5, %v1754_v60  ;;  %v1786_v21 = vld [vmem:[#allocation4 + $0x50] sm:$0xff] (!%p2078_p10)  ;;  %v1899_v53 = vadd.f32 (!%p2078_p10), %v1866_v55, %v1787_v12  ;;  %v1886_v60 = vpop.permute.xlu1 (!%p2078_p10), %1885 }
 0x3d4   : > { %1770 = vst.msk [vmem:[#allocation4 + $0x70] sm:$0xff] %vm1755_vm5, %v1753_v0  ;;  %v1898_v58 = vadd.f32 (!%p2078_p10), %v1861_v36, %v1786_v21 }
 0x3d5   : > { %1915 = vst.msk [vmem:[%s3383_s5 + $0x58] sm:$0xff] %vm1755_vm5, %v1899_v53 }
 0x3d6   : > { %v1789_v13 = vld [vmem:[#allocation4 + $0x68] sm:$0xff]  ;;  %1914 = vst.msk [vmem:[%s3383_s5 + $0x50] sm:$0xff] %vm1755_vm5, %v1898_v58 }
 0x3d7   : > { %v1788_v11 = vld [vmem:[#allocation4 + $0x60] sm:$0xff]  ;;  %v1901_v63 = vadd.f32 %v1876_v59, %v1789_v13 }
 0x3d8   : > { %v1900_v15 = vadd.f32 %v1871_v38, %v1788_v11 }
 0x3d9   : > { %1917 = vst.msk [vmem:[%s3383_s5 + $0x68] sm:$0xff] %vm1755_vm5, %v1901_v63 }
 0x3da   : > { %v1791_v62 = vld [vmem:[#allocation4 + $0x78] sm:$0xff]  ;;  %1916 = vst.msk [vmem:[%s3383_s5 + $0x60] sm:$0xff] %vm1755_vm5, %v1900_v15 }
 0x3db   : > { %v1790_v4 = vld [vmem:[#allocation4 + $0x70] sm:$0xff]  ;;  %v1903_v0 = vadd.f32 %v1886_v60, %v1791_v62 }
 0x3dd   : > { %1919 = vst.msk [vmem:[%s3383_s5 + $0x78] sm:$0xff] %vm1755_vm5, %v1903_v0 }
 0x435   : > { %v1881_v54 = vpop.permute.xlu0 %1880 }
 0x436   : > { %v1902_v61 = vadd.f32 %v1881_v54, %v1790_v4 }
 0x438   : > { %1918 = vst.msk [vmem:[%s3383_s5 + $0x70] sm:$0xff] %vm1755_vm5, %v1902_v61 }
 0x439 PF: > { %p12_p11 = scmp.ge.s32.totalorder %s2711_s22, 4   ;;  %s3384_s18 = smov %s2651_s19 }
 0x43a   : > { %s3385_s19 = smov %s2720_s25  ;;  %s3386_s20 = smov %s2711_s22 }
 0x43b   :  { %14 = sbr.rel (!%p12_p11) target bundleno = 2 (0x2), region = 127 }

</bundles_post_ra>
